<compile_context>
chip_gen: v6e
topology: v6e:2x2x1
jax: 0.10.0
libtpu: 0.0.40
codegen_flags: <defaults>
</compile_context>

<pallas_src>
import functools

import numpy as np
import jax
import jax.numpy as jnp
from jax.experimental import pallas as pl
from jax.experimental.pallas import tpu as pltpu

NEG_SLOPE = 0.3  # LeakyReLU(0.3)


def _leaky(x):
    # max(x, 0.3*x) == LeakyReLU(0.3) for slope < 1; one VALU op fewer than
    # cmp+select.
    return jnp.maximum(x, NEG_SLOPE * x)


# --------------------------- fused forward kernel ---------------------------
def fused_disc_kernel(std_ref, x_ref, noise_ref,
                      r1_ref, t1_ref, b1_ref,
                      r2_ref, t2_ref, b2_ref,
                      r3_ref, t3_ref, b3_ref,
                      w1_ref, c1_ref, w2_ref, c2_ref,
                      o_ref, *, pool_hw):
    std = std_ref[0, 0]
    # noise injection: x + randn * std (noise drawn on host with JAX RNG).
    act = x_ref[0] + noise_ref[0] * std                         # (H, W*Cin) fp32

    # features1: 3 x (Conv2d 3x3, stride 2, valid + LeakyReLU(0.3)),
    # each conv expressed as bf16 MXU matmuls with fp32 accumulation.
    for r_ref, t_ref, b_ref in ((r1_ref, t1_ref, b1_ref),
                                (r2_ref, t2_ref, b2_ref),
                                (r3_ref, t3_ref, b3_ref)):
        a_bf = act.astype(jnp.bfloat16)
        acc = b_ref[...]                                         # (1, Wout*Cout) fp32
        for kh in range(3):
            rows = jnp.dot(r_ref[kh], a_bf,                      # (Hout, Win*Cin)
                           preferred_element_type=jnp.float32)
            acc = acc + jnp.dot(rows.astype(jnp.bfloat16), t_ref[kh],
                                preferred_element_type=jnp.float32)
        act = _leaky(acc)                                        # (Hout, Wout*Cout)

    # AdaptiveAvgPool2d((1,1)) + flatten.  act is (Hf, Wf*128); for a 16x16
    # input Hf == Wf == 1 so this reduces to the single row.
    h_f, w_f = pool_hw
    if w_f == 1:
        pooled = jnp.sum(act, axis=0, keepdims=True) * (1.0 / h_f)      # (1, 128)
    else:
        c_f = act.shape[1] // w_f
        col_sum = jnp.sum(act, axis=0, keepdims=True).reshape(w_f, c_f)
        pooled = jnp.sum(col_sum, axis=0, keepdims=True) * (1.0 / (h_f * w_f))

    # classifier: Dropout -> Linear(128,256) -> LeakyReLU -> Dropout -> Linear(256,2)
    # TODO(synk): nn.Dropout(0.5) is stochastic; eval-mode identity is used here.
    h = _leaky(jnp.dot(pooled.astype(jnp.bfloat16), w1_ref[...],
                       preferred_element_type=jnp.float32) + c1_ref[...])
    out = jnp.dot(h.astype(jnp.bfloat16), w2_ref[...],
                  preferred_element_type=jnp.float32) + c2_ref[...]
    o_ref[0] = out                                               # (1, 2)


# ------------------------ host-side conv lowering ---------------------------
def _lower_conv(w_conv, b_conv, h_in, w_in, stride=2):
    """Lower Conv2d(k=3, stride=2, pad=0) acting on an (H, W*Cin) slab into
    operands for:  out = sum_kh (R[kh] @ act) @ T[kh] + bias_row."""
    w_np = np.asarray(w_conv, np.float32)             # (Cout, Cin, 3, 3)
    b_np = np.asarray(b_conv, np.float32)             # (Cout,)
    cout, cin, kh_sz, kw_sz = w_np.shape
    h_out = (h_in - kh_sz) // stride + 1
    w_out = (w_in - kw_sz) // stride + 1

    rsel = np.zeros((kh_sz, h_out, h_in), np.float32)
    for kh in range(kh_sz):
        rsel[kh, np.arange(h_out), stride * np.arange(h_out) + kh] = 1.0

    toep = np.zeros((kh_sz, w_in * cin, w_out * cout), np.float32)
    for kh in range(kh_sz):
        for kw in range(kw_sz):
            blk = w_np[:, :, kh, kw].T                # (Cin, Cout)
            for wo in range(w_out):
                wi = stride * wo + kw
                toep[kh, wi * cin:(wi + 1) * cin, wo * cout:(wo + 1) * cout] += blk

    bias_row = np.tile(b_np, w_out)[None, :]          # (1, Wout*Cout)
    return (jnp.asarray(rsel, jnp.bfloat16), jnp.asarray(toep, jnp.bfloat16),
            jnp.asarray(bias_row, jnp.float32), h_out, w_out)


def _uniform(key, shape, fan_in):
    bound = 1.0 / (fan_in ** 0.5)
    return jax.random.uniform(key, shape, jnp.float32, -bound, bound)


# --------------------------------- module -----------------------------------
class Discriminator:
    """Pallas port of the PyTorch Discriminator (dropout layers in eval mode)."""

    def __init__(self, key):
        ks = jax.random.split(key, 10)
        conv_cfg = [(32, 3), (64, 32), (128, 64)]      # (Cout, Cin)
        self.conv_w, self.conv_b = [], []
        for i, (cout, cin) in enumerate(conv_cfg):
            fan_in = cin * 9
            self.conv_w.append(_uniform(ks[2 * i], (cout, cin, 3, 3), fan_in))
            self.conv_b.append(_uniform(ks[2 * i + 1], (cout,), fan_in))
        w1 = _uniform(ks[6], (256, 128), 128)
        b1 = _uniform(ks[7], (256,), 128)
        w2 = _uniform(ks[8], (2, 256), 256)
        b2 = _uniform(ks[9], (2,), 256)
        self.w1 = jnp.asarray(w1.T, jnp.bfloat16)      # (128, 256)
        self.c1 = jnp.asarray(b1[None, :], jnp.float32)
        self.w2 = jnp.asarray(w2.T, jnp.bfloat16)      # (256, 2)
        self.c2 = jnp.asarray(b2[None, :], jnp.float32)
        self._lowered = {}                             # (H, W) -> conv matmul operands
        self._forwards = {}                            # (N, C, H, W) -> jitted forward

    # ---- cached host-side lowering of the conv stack for a spatial size ----
    def _conv_operands(self, h, w):
        if (h, w) not in self._lowered:
            layers, hh, ww = [], h, w
            for w_conv, b_conv in zip(self.conv_w, self.conv_b):
                rsel, toep, brow, hh, ww = _lower_conv(w_conv, b_conv, hh, ww)
                layers.append((rsel, toep, brow))
            self._lowered[(h, w)] = (tuple(layers), hh, ww)
        return self._lowered[(h, w)]

    def _weight_inputs(self, h, w):
        layers, _, _ = self._conv_operands(h, w)
        inputs = []
        for rsel, toep, brow in layers:
            inputs += [rsel, toep, brow]
        inputs += [self.w1, self.c1, self.w2, self.c2]
        return inputs

    # ---- build (and cache) the jitted forward for one input shape ----------
    def _get_forward(self, n, c, h, w):
        key = (n, c, h, w)
        if key in self._forwards:
            return self._forwards[key]

        layers, h_f, w_f = self._conv_operands(h, w)

        img_map = lambda b: (b, 0, 0)
        zmap3 = lambda b: (0, 0, 0)
        zmap2 = lambda b: (0, 0)

        w_specs = []
        for rsel, toep, brow in layers:
            w_specs += [pl.BlockSpec(rsel.shape, zmap3),
                        pl.BlockSpec(toep.shape, zmap3),
                        pl.BlockSpec(brow.shape, zmap2)]
        w_specs += [pl.BlockSpec(self.w1.shape, zmap2),
                    pl.BlockSpec(self.c1.shape, zmap2),
                    pl.BlockSpec(self.w2.shape, zmap2),
                    pl.BlockSpec(self.c2.shape, zmap2)]

        kernel_call = pl.pallas_call(
            functools.partial(fused_disc_kernel, pool_hw=(h_f, w_f)),
            out_shape=jax.ShapeDtypeStruct((n, 1, 2), jnp.float32),
            grid_spec=pltpu.PrefetchScalarGridSpec(
                num_scalar_prefetch=0,
                grid=(n,),
                in_specs=[pl.BlockSpec(memory_space=pltpu.MemorySpace.SMEM),  # std
                          pl.BlockSpec((1, h, w * c), img_map),               # x slab
                          pl.BlockSpec((1, h, w * c), img_map)] + w_specs,    # noise
                out_specs=pl.BlockSpec((1, 1, 2), img_map),
            ),
            compiler_params=pltpu.CompilerParams(
                dimension_semantics=("parallel",)),
        )

        def forward(x_nchw, std_scalar, noise_key, *weights):
            # NCHW -> lane-dense (N, H, W*C) slab; noise drawn in same layout.
            x_rows = jnp.transpose(x_nchw, (0, 2, 3, 1)).reshape(n, h, w * c)
            x_rows = x_rows.astype(jnp.float32)
            noise = jax.random.normal(noise_key, (n, h, w * c), jnp.float32)
            std_arr = jnp.full((1, 1), std_scalar, jnp.float32)
            out = kernel_call(std_arr, x_rows, noise, *weights)
            return out.reshape(n, 2)

        fwd = jax.jit(forward)
        self._forwards[key] = fwd
        return fwd

    def __call__(self, x_nchw, std, noise_key):
        n, c, h, w = x_nchw.shape
        fwd = self._get_forward(n, c, h, w)
        return fwd(x_nchw, jnp.asarray(std, jnp.float32), noise_key,
                   *self._weight_inputs(h, w))


if __name__ == "__main__":
    key = jax.random.PRNGKey(0)
    pkey, xkey, nkey = jax.random.split(key, 3)
    model = Discriminator(pkey)
    x = jax.random.normal(xkey, (2, 3, 16, 16), jnp.float32)   # NCHW, like PyTorch
    out = model(x, std=0.1, noise_key=nkey)
    jax.block_until_ready(out)
    assert out.shape == (2, 2) and out.dtype == jnp.float32
    assert bool(jnp.all(jnp.isfinite(out)))
    print("KERNEL_OK")
</pallas_src>

<mosaic_0001>
module attributes {stable_mosaic.version = 11 : i64} {
  func.func @fused_disc_kernel(%arg0: i32, %arg1: memref<1x1xf32, #tpu.memory_space<smem>>, %arg2: memref<1x16x48xf32, #tpu.memory_space<vmem>>, %arg3: memref<1x16x48xf32, #tpu.memory_space<vmem>>, %arg4: memref<3x7x16xbf16, #tpu.memory_space<vmem>>, %arg5: memref<3x48x224xbf16, #tpu.memory_space<vmem>>, %arg6: memref<1x224xf32, #tpu.memory_space<vmem>>, %arg7: memref<3x3x7xbf16, #tpu.memory_space<vmem>>, %arg8: memref<3x224x192xbf16, #tpu.memory_space<vmem>>, %arg9: memref<1x192xf32, #tpu.memory_space<vmem>>, %arg10: memref<3x1x3xbf16, #tpu.memory_space<vmem>>, %arg11: memref<3x192x128xbf16, #tpu.memory_space<vmem>>, %arg12: memref<1x128xf32, #tpu.memory_space<vmem>>, %arg13: memref<128x256xbf16, #tpu.memory_space<vmem>>, %arg14: memref<1x256xf32, #tpu.memory_space<vmem>>, %arg15: memref<256x2xbf16, #tpu.memory_space<vmem>>, %arg16: memref<1x2xf32, #tpu.memory_space<vmem>>, %arg17: memref<1x1x2xf32, #tpu.memory_space<vmem>>) attributes {dimension_semantics = [#tpu.dimension_semantics<parallel>], iteration_bounds = array<i64: 2>, scalar_prefetch = 0 : i64, scratch_operands = 0 : i64, tpu.core_type = #tpu.core_type<tc>, window_params = [{transform_indices = @transform_0, window_bounds = array<i64: 1, 1>}, {transform_indices = @transform_1, window_bounds = array<i64: 1, 16, 48>}, {transform_indices = @transform_2, window_bounds = array<i64: 1, 16, 48>}, {pipeline_mode = #tpu.pipeline_mode<synchronous>, transform_indices = @transform_3, window_bounds = array<i64: 3, 7, 16>}, {pipeline_mode = #tpu.pipeline_mode<synchronous>, transform_indices = @transform_4, window_bounds = array<i64: 3, 48, 224>}, {pipeline_mode = #tpu.pipeline_mode<synchronous>, transform_indices = @transform_5, window_bounds = array<i64: 1, 224>}, {pipeline_mode = #tpu.pipeline_mode<synchronous>, transform_indices = @transform_6, window_bounds = array<i64: 3, 3, 7>}, {pipeline_mode = #tpu.pipeline_mode<synchronous>, transform_indices = @transform_7, window_bounds = array<i64: 3, 224, 192>}, {pipeline_mode = #tpu.pipeline_mode<synchronous>, transform_indices = @transform_8, window_bounds = array<i64: 1, 192>}, {pipeline_mode = #tpu.pipeline_mode<synchronous>, transform_indices = @transform_9, window_bounds = array<i64: 3, 1, 3>}, {pipeline_mode = #tpu.pipeline_mode<synchronous>, transform_indices = @transform_10, window_bounds = array<i64: 3, 192, 128>}, {pipeline_mode = #tpu.pipeline_mode<synchronous>, transform_indices = @transform_11, window_bounds = array<i64: 1, 128>}, {pipeline_mode = #tpu.pipeline_mode<synchronous>, transform_indices = @transform_12, window_bounds = array<i64: 128, 256>}, {pipeline_mode = #tpu.pipeline_mode<synchronous>, transform_indices = @transform_13, window_bounds = array<i64: 1, 256>}, {pipeline_mode = #tpu.pipeline_mode<synchronous>, transform_indices = @transform_14, window_bounds = array<i64: 256, 2>}, {pipeline_mode = #tpu.pipeline_mode<synchronous>, transform_indices = @transform_15, window_bounds = array<i64: 1, 2>}, {transform_indices = @transform_16, window_bounds = array<i64: 1, 1, 2>}]} {
    %c0 = arith.constant 0 : index
    %c0_0 = arith.constant 0 : index
    %0 = memref.load %arg1[%c0, %c0_0] : memref<1x1xf32, #tpu.memory_space<smem>>
    %c0_1 = arith.constant 0 : index
    %c0_2 = arith.constant 0 : index
    %c0_3 = arith.constant 0 : index
    %1 = vector.load %arg2[%c0_1, %c0_2, %c0_3] : memref<1x16x48xf32, #tpu.memory_space<vmem>>, vector<1x16x48xf32>
    %2 = vector.shape_cast %1 : vector<1x16x48xf32> to vector<16x48xf32>
    %c0_4 = arith.constant 0 : index
    %c0_5 = arith.constant 0 : index
    %c0_6 = arith.constant 0 : index
    %3 = vector.load %arg3[%c0_4, %c0_5, %c0_6] : memref<1x16x48xf32, #tpu.memory_space<vmem>>, vector<1x16x48xf32>
    %4 = vector.shape_cast %3 : vector<1x16x48xf32> to vector<16x48xf32>
    %5 = vector.broadcast %0 : f32 to vector<16x48xf32>
    %6 = arith.mulf %4, %5 : vector<16x48xf32>
    %7 = arith.addf %2, %6 : vector<16x48xf32>
    %8 = arith.truncf %7 : vector<16x48xf32> to vector<16x48xbf16>
    %c0_7 = arith.constant 0 : index
    %c0_8 = arith.constant 0 : index
    %9 = vector.load %arg6[%c0_7, %c0_8] : memref<1x224xf32, #tpu.memory_space<vmem>>, vector<1x224xf32>
    %c0_9 = arith.constant 0 : index
    %c0_10 = arith.constant 0 : index
    %c0_11 = arith.constant 0 : index
    %10 = vector.load %arg4[%c0_9, %c0_10, %c0_11] : memref<3x7x16xbf16, #tpu.memory_space<vmem>>, vector<1x7x16xbf16>
    %11 = vector.shape_cast %10 : vector<1x7x16xbf16> to vector<7x16xbf16>
    %cst = arith.constant dense<0.000000e+00> : vector<7x48xf32>
    %12 = tpu.matmul %11, %8, %cst {dimension_numbers = #tpu.dot_dimension_numbers<[1], [0], [0], [1], [0, 0, 1, 1], [], []>} : vector<7x16xbf16>, vector<16x48xbf16>, vector<7x48xf32> -> vector<7x48xf32>
    %13 = arith.truncf %12 : vector<7x48xf32> to vector<7x48xbf16>
    %c0_12 = arith.constant 0 : index
    %c0_13 = arith.constant 0 : index
    %c0_14 = arith.constant 0 : index
    %14 = vector.load %arg5[%c0_12, %c0_13, %c0_14] : memref<3x48x224xbf16, #tpu.memory_space<vmem>>, vector<1x48x224xbf16>
    %15 = vector.shape_cast %14 : vector<1x48x224xbf16> to vector<48x224xbf16>
    %cst_15 = arith.constant dense<0.000000e+00> : vector<7x224xf32>
    %16 = tpu.matmul %13, %15, %cst_15 {dimension_numbers = #tpu.dot_dimension_numbers<[1], [0], [0], [1], [0, 0, 1, 1], [], []>} : vector<7x48xbf16>, vector<48x224xbf16>, vector<7x224xf32> -> vector<7x224xf32>
    %17 = vector.broadcast %9 : vector<1x224xf32> to vector<7x224xf32>
    %18 = arith.addf %17, %16 : vector<7x224xf32>
    %c1 = arith.constant 1 : index
    %c0_16 = arith.constant 0 : index
    %c0_17 = arith.constant 0 : index
    %19 = vector.load %arg4[%c1, %c0_16, %c0_17] : memref<3x7x16xbf16, #tpu.memory_space<vmem>>, vector<1x7x16xbf16>
    %20 = vector.shape_cast %19 : vector<1x7x16xbf16> to vector<7x16xbf16>
    %cst_18 = arith.constant dense<0.000000e+00> : vector<7x48xf32>
    %21 = tpu.matmul %20, %8, %cst_18 {dimension_numbers = #tpu.dot_dimension_numbers<[1], [0], [0], [1], [0, 0, 1, 1], [], []>} : vector<7x16xbf16>, vector<16x48xbf16>, vector<7x48xf32> -> vector<7x48xf32>
    %22 = arith.truncf %21 : vector<7x48xf32> to vector<7x48xbf16>
    %c1_19 = arith.constant 1 : index
    %c0_20 = arith.constant 0 : index
    %c0_21 = arith.constant 0 : index
    %23 = vector.load %arg5[%c1_19, %c0_20, %c0_21] : memref<3x48x224xbf16, #tpu.memory_space<vmem>>, vector<1x48x224xbf16>
    %24 = vector.shape_cast %23 : vector<1x48x224xbf16> to vector<48x224xbf16>
    %cst_22 = arith.constant dense<0.000000e+00> : vector<7x224xf32>
    %25 = tpu.matmul %22, %24, %cst_22 {dimension_numbers = #tpu.dot_dimension_numbers<[1], [0], [0], [1], [0, 0, 1, 1], [], []>} : vector<7x48xbf16>, vector<48x224xbf16>, vector<7x224xf32> -> vector<7x224xf32>
    %26 = arith.addf %18, %25 : vector<7x224xf32>
    %c2 = arith.constant 2 : index
    %c0_23 = arith.constant 0 : index
    %c0_24 = arith.constant 0 : index
    %27 = vector.load %arg4[%c2, %c0_23, %c0_24] : memref<3x7x16xbf16, #tpu.memory_space<vmem>>, vector<1x7x16xbf16>
    %28 = vector.shape_cast %27 : vector<1x7x16xbf16> to vector<7x16xbf16>
    %cst_25 = arith.constant dense<0.000000e+00> : vector<7x48xf32>
    %29 = tpu.matmul %28, %8, %cst_25 {dimension_numbers = #tpu.dot_dimension_numbers<[1], [0], [0], [1], [0, 0, 1, 1], [], []>} : vector<7x16xbf16>, vector<16x48xbf16>, vector<7x48xf32> -> vector<7x48xf32>
    %30 = arith.truncf %29 : vector<7x48xf32> to vector<7x48xbf16>
    %c2_26 = arith.constant 2 : index
    %c0_27 = arith.constant 0 : index
    %c0_28 = arith.constant 0 : index
    %31 = vector.load %arg5[%c2_26, %c0_27, %c0_28] : memref<3x48x224xbf16, #tpu.memory_space<vmem>>, vector<1x48x224xbf16>
    %32 = vector.shape_cast %31 : vector<1x48x224xbf16> to vector<48x224xbf16>
    %cst_29 = arith.constant dense<0.000000e+00> : vector<7x224xf32>
    %33 = tpu.matmul %30, %32, %cst_29 {dimension_numbers = #tpu.dot_dimension_numbers<[1], [0], [0], [1], [0, 0, 1, 1], [], []>} : vector<7x48xbf16>, vector<48x224xbf16>, vector<7x224xf32> -> vector<7x224xf32>
    %34 = arith.addf %26, %33 : vector<7x224xf32>
    %cst_30 = arith.constant 3.000000e-01 : f32
    %35 = vector.broadcast %cst_30 : f32 to vector<7x224xf32>
    %36 = arith.mulf %35, %34 : vector<7x224xf32>
    %37 = arith.maximumf %34, %36 : vector<7x224xf32>
    %38 = arith.truncf %37 : vector<7x224xf32> to vector<7x224xbf16>
    %c0_31 = arith.constant 0 : index
    %c0_32 = arith.constant 0 : index
    %39 = vector.load %arg9[%c0_31, %c0_32] : memref<1x192xf32, #tpu.memory_space<vmem>>, vector<1x192xf32>
    %c0_33 = arith.constant 0 : index
    %c0_34 = arith.constant 0 : index
    %c0_35 = arith.constant 0 : index
    %40 = vector.load %arg7[%c0_33, %c0_34, %c0_35] : memref<3x3x7xbf16, #tpu.memory_space<vmem>>, vector<1x3x7xbf16>
    %41 = vector.shape_cast %40 : vector<1x3x7xbf16> to vector<3x7xbf16>
    %cst_36 = arith.constant dense<0.000000e+00> : vector<3x224xf32>
    %42 = tpu.matmul %41, %38, %cst_36 {dimension_numbers = #tpu.dot_dimension_numbers<[1], [0], [0], [1], [0, 0, 1, 1], [], []>} : vector<3x7xbf16>, vector<7x224xbf16>, vector<3x224xf32> -> vector<3x224xf32>
    %43 = arith.truncf %42 : vector<3x224xf32> to vector<3x224xbf16>
    %c0_37 = arith.constant 0 : index
    %c0_38 = arith.constant 0 : index
    %c0_39 = arith.constant 0 : index
    %44 = vector.load %arg8[%c0_37, %c0_38, %c0_39] : memref<3x224x192xbf16, #tpu.memory_space<vmem>>, vector<1x224x192xbf16>
    %45 = vector.shape_cast %44 : vector<1x224x192xbf16> to vector<224x192xbf16>
    %cst_40 = arith.constant dense<0.000000e+00> : vector<3x192xf32>
    %46 = tpu.matmul %43, %45, %cst_40 {dimension_numbers = #tpu.dot_dimension_numbers<[1], [0], [0], [1], [0, 0, 1, 1], [], []>} : vector<3x224xbf16>, vector<224x192xbf16>, vector<3x192xf32> -> vector<3x192xf32>
    %47 = vector.broadcast %39 : vector<1x192xf32> to vector<3x192xf32>
    %48 = arith.addf %47, %46 : vector<3x192xf32>
    %c1_41 = arith.constant 1 : index
    %c0_42 = arith.constant 0 : index
    %c0_43 = arith.constant 0 : index
    %49 = vector.load %arg7[%c1_41, %c0_42, %c0_43] : memref<3x3x7xbf16, #tpu.memory_space<vmem>>, vector<1x3x7xbf16>
    %50 = vector.shape_cast %49 : vector<1x3x7xbf16> to vector<3x7xbf16>
    %cst_44 = arith.constant dense<0.000000e+00> : vector<3x224xf32>
    %51 = tpu.matmul %50, %38, %cst_44 {dimension_numbers = #tpu.dot_dimension_numbers<[1], [0], [0], [1], [0, 0, 1, 1], [], []>} : vector<3x7xbf16>, vector<7x224xbf16>, vector<3x224xf32> -> vector<3x224xf32>
    %52 = arith.truncf %51 : vector<3x224xf32> to vector<3x224xbf16>
    %c1_45 = arith.constant 1 : index
    %c0_46 = arith.constant 0 : index
    %c0_47 = arith.constant 0 : index
    %53 = vector.load %arg8[%c1_45, %c0_46, %c0_47] : memref<3x224x192xbf16, #tpu.memory_space<vmem>>, vector<1x224x192xbf16>
    %54 = vector.shape_cast %53 : vector<1x224x192xbf16> to vector<224x192xbf16>
    %cst_48 = arith.constant dense<0.000000e+00> : vector<3x192xf32>
    %55 = tpu.matmul %52, %54, %cst_48 {dimension_numbers = #tpu.dot_dimension_numbers<[1], [0], [0], [1], [0, 0, 1, 1], [], []>} : vector<3x224xbf16>, vector<224x192xbf16>, vector<3x192xf32> -> vector<3x192xf32>
    %56 = arith.addf %48, %55 : vector<3x192xf32>
    %c2_49 = arith.constant 2 : index
    %c0_50 = arith.constant 0 : index
    %c0_51 = arith.constant 0 : index
    %57 = vector.load %arg7[%c2_49, %c0_50, %c0_51] : memref<3x3x7xbf16, #tpu.memory_space<vmem>>, vector<1x3x7xbf16>
    %58 = vector.shape_cast %57 : vector<1x3x7xbf16> to vector<3x7xbf16>
    %cst_52 = arith.constant dense<0.000000e+00> : vector<3x224xf32>
    %59 = tpu.matmul %58, %38, %cst_52 {dimension_numbers = #tpu.dot_dimension_numbers<[1], [0], [0], [1], [0, 0, 1, 1], [], []>} : vector<3x7xbf16>, vector<7x224xbf16>, vector<3x224xf32> -> vector<3x224xf32>
    %60 = arith.truncf %59 : vector<3x224xf32> to vector<3x224xbf16>
    %c2_53 = arith.constant 2 : index
    %c0_54 = arith.constant 0 : index
    %c0_55 = arith.constant 0 : index
    %61 = vector.load %arg8[%c2_53, %c0_54, %c0_55] : memref<3x224x192xbf16, #tpu.memory_space<vmem>>, vector<1x224x192xbf16>
    %62 = vector.shape_cast %61 : vector<1x224x192xbf16> to vector<224x192xbf16>
    %cst_56 = arith.constant dense<0.000000e+00> : vector<3x192xf32>
    %63 = tpu.matmul %60, %62, %cst_56 {dimension_numbers = #tpu.dot_dimension_numbers<[1], [0], [0], [1], [0, 0, 1, 1], [], []>} : vector<3x224xbf16>, vector<224x192xbf16>, vector<3x192xf32> -> vector<3x192xf32>
    %64 = arith.addf %56, %63 : vector<3x192xf32>
    %cst_57 = arith.constant 3.000000e-01 : f32
    %65 = vector.broadcast %cst_57 : f32 to vector<3x192xf32>
    %66 = arith.mulf %65, %64 : vector<3x192xf32>
    %67 = arith.maximumf %64, %66 : vector<3x192xf32>
    %68 = arith.truncf %67 : vector<3x192xf32> to vector<3x192xbf16>
    %c0_58 = arith.constant 0 : index
    %c0_59 = arith.constant 0 : index
    %69 = vector.load %arg12[%c0_58, %c0_59] : memref<1x128xf32, #tpu.memory_space<vmem>>, vector<1x128xf32>
    %c0_60 = arith.constant 0 : index
    %c0_61 = arith.constant 0 : index
    %c0_62 = arith.constant 0 : index
    %70 = vector.load %arg10[%c0_60, %c0_61, %c0_62] : memref<3x1x3xbf16, #tpu.memory_space<vmem>>, vector<1x1x3xbf16>
    %71 = vector.shape_cast %70 : vector<1x1x3xbf16> to vector<1x3xbf16>
    %cst_63 = arith.constant dense<0.000000e+00> : vector<1x192xf32>
    %72 = tpu.matmul %71, %68, %cst_63 {dimension_numbers = #tpu.dot_dimension_numbers<[1], [0], [0], [1], [0, 0, 1, 1], [], []>} : vector<1x3xbf16>, vector<3x192xbf16>, vector<1x192xf32> -> vector<1x192xf32>
    %73 = arith.truncf %72 : vector<1x192xf32> to vector<1x192xbf16>
    %c0_64 = arith.constant 0 : index
    %c0_65 = arith.constant 0 : index
    %c0_66 = arith.constant 0 : index
    %74 = vector.load %arg11[%c0_64, %c0_65, %c0_66] : memref<3x192x128xbf16, #tpu.memory_space<vmem>>, vector<1x192x128xbf16>
    %75 = vector.shape_cast %74 : vector<1x192x128xbf16> to vector<192x128xbf16>
    %cst_67 = arith.constant dense<0.000000e+00> : vector<1x128xf32>
    %76 = tpu.matmul %73, %75, %cst_67 {dimension_numbers = #tpu.dot_dimension_numbers<[1], [0], [0], [1], [0, 0, 1, 1], [], []>} : vector<1x192xbf16>, vector<192x128xbf16>, vector<1x128xf32> -> vector<1x128xf32>
    %77 = arith.addf %69, %76 : vector<1x128xf32>
    %c1_68 = arith.constant 1 : index
    %c0_69 = arith.constant 0 : index
    %c0_70 = arith.constant 0 : index
    %78 = vector.load %arg10[%c1_68, %c0_69, %c0_70] : memref<3x1x3xbf16, #tpu.memory_space<vmem>>, vector<1x1x3xbf16>
    %79 = vector.shape_cast %78 : vector<1x1x3xbf16> to vector<1x3xbf16>
    %cst_71 = arith.constant dense<0.000000e+00> : vector<1x192xf32>
    %80 = tpu.matmul %79, %68, %cst_71 {dimension_numbers = #tpu.dot_dimension_numbers<[1], [0], [0], [1], [0, 0, 1, 1], [], []>} : vector<1x3xbf16>, vector<3x192xbf16>, vector<1x192xf32> -> vector<1x192xf32>
    %81 = arith.truncf %80 : vector<1x192xf32> to vector<1x192xbf16>
    %c1_72 = arith.constant 1 : index
    %c0_73 = arith.constant 0 : index
    %c0_74 = arith.constant 0 : index
    %82 = vector.load %arg11[%c1_72, %c0_73, %c0_74] : memref<3x192x128xbf16, #tpu.memory_space<vmem>>, vector<1x192x128xbf16>
    %83 = vector.shape_cast %82 : vector<1x192x128xbf16> to vector<192x128xbf16>
    %cst_75 = arith.constant dense<0.000000e+00> : vector<1x128xf32>
    %84 = tpu.matmul %81, %83, %cst_75 {dimension_numbers = #tpu.dot_dimension_numbers<[1], [0], [0], [1], [0, 0, 1, 1], [], []>} : vector<1x192xbf16>, vector<192x128xbf16>, vector<1x128xf32> -> vector<1x128xf32>
    %85 = arith.addf %77, %84 : vector<1x128xf32>
    %c2_76 = arith.constant 2 : index
    %c0_77 = arith.constant 0 : index
    %c0_78 = arith.constant 0 : index
    %86 = vector.load %arg10[%c2_76, %c0_77, %c0_78] : memref<3x1x3xbf16, #tpu.memory_space<vmem>>, vector<1x1x3xbf16>
    %87 = vector.shape_cast %86 : vector<1x1x3xbf16> to vector<1x3xbf16>
    %cst_79 = arith.constant dense<0.000000e+00> : vector<1x192xf32>
    %88 = tpu.matmul %87, %68, %cst_79 {dimension_numbers = #tpu.dot_dimension_numbers<[1], [0], [0], [1], [0, 0, 1, 1], [], []>} : vector<1x3xbf16>, vector<3x192xbf16>, vector<1x192xf32> -> vector<1x192xf32>
    %89 = arith.truncf %88 : vector<1x192xf32> to vector<1x192xbf16>
    %c2_80 = arith.constant 2 : index
    %c0_81 = arith.constant 0 : index
    %c0_82 = arith.constant 0 : index
    %90 = vector.load %arg11[%c2_80, %c0_81, %c0_82] : memref<3x192x128xbf16, #tpu.memory_space<vmem>>, vector<1x192x128xbf16>
    %91 = vector.shape_cast %90 : vector<1x192x128xbf16> to vector<192x128xbf16>
    %cst_83 = arith.constant dense<0.000000e+00> : vector<1x128xf32>
    %92 = tpu.matmul %89, %91, %cst_83 {dimension_numbers = #tpu.dot_dimension_numbers<[1], [0], [0], [1], [0, 0, 1, 1], [], []>} : vector<1x192xbf16>, vector<192x128xbf16>, vector<1x128xf32> -> vector<1x128xf32>
    %93 = arith.addf %85, %92 : vector<1x128xf32>
    %cst_84 = arith.constant 3.000000e-01 : f32
    %94 = vector.broadcast %cst_84 : f32 to vector<1x128xf32>
    %95 = arith.mulf %94, %93 : vector<1x128xf32>
    %96 = arith.maximumf %93, %95 : vector<1x128xf32>
    %cst_85 = arith.constant dense<0.000000e+00> : vector<128xf32>
    %97 = vector.multi_reduction <add>, %96, %cst_85 [0] : vector<1x128xf32> to vector<128xf32>
    %98 = vector.shape_cast %97 : vector<128xf32> to vector<1x128xf32>
    %cst_86 = arith.constant 1.000000e+00 : f32
    %99 = vector.broadcast %cst_86 : f32 to vector<1x128xf32>
    %100 = arith.mulf %98, %99 : vector<1x128xf32>
    %101 = arith.truncf %100 : vector<1x128xf32> to vector<1x128xbf16>
    %c0_87 = arith.constant 0 : index
    %c0_88 = arith.constant 0 : index
    %102 = vector.load %arg13[%c0_87, %c0_88] : memref<128x256xbf16, #tpu.memory_space<vmem>>, vector<128x256xbf16>
    %cst_89 = arith.constant dense<0.000000e+00> : vector<1x256xf32>
    %103 = tpu.matmul %101, %102, %cst_89 {dimension_numbers = #tpu.dot_dimension_numbers<[1], [0], [0], [1], [0, 0, 1, 1], [], []>} : vector<1x128xbf16>, vector<128x256xbf16>, vector<1x256xf32> -> vector<1x256xf32>
    %c0_90 = arith.constant 0 : index
    %c0_91 = arith.constant 0 : index
    %104 = vector.load %arg14[%c0_90, %c0_91] : memref<1x256xf32, #tpu.memory_space<vmem>>, vector<1x256xf32>
    %105 = arith.addf %103, %104 : vector<1x256xf32>
    %cst_92 = arith.constant 3.000000e-01 : f32
    %106 = vector.broadcast %cst_92 : f32 to vector<1x256xf32>
    %107 = arith.mulf %106, %105 : vector<1x256xf32>
    %108 = arith.maximumf %105, %107 : vector<1x256xf32>
    %109 = arith.truncf %108 : vector<1x256xf32> to vector<1x256xbf16>
    %c0_93 = arith.constant 0 : index
    %c0_94 = arith.constant 0 : index
    %110 = vector.load %arg15[%c0_93, %c0_94] : memref<256x2xbf16, #tpu.memory_space<vmem>>, vector<256x2xbf16>
    %cst_95 = arith.constant dense<0.000000e+00> : vector<1x2xf32>
    %111 = tpu.matmul %109, %110, %cst_95 {dimension_numbers = #tpu.dot_dimension_numbers<[1], [0], [0], [1], [0, 0, 1, 1], [], []>} : vector<1x256xbf16>, vector<256x2xbf16>, vector<1x2xf32> -> vector<1x2xf32>
    %c0_96 = arith.constant 0 : index
    %c0_97 = arith.constant 0 : index
    %112 = vector.load %arg16[%c0_96, %c0_97] : memref<1x2xf32, #tpu.memory_space<vmem>>, vector<1x2xf32>
    %113 = arith.addf %111, %112 : vector<1x2xf32>
    %c0_98 = arith.constant 0 : index
    %c0_99 = arith.constant 0 : index
    %c0_100 = arith.constant 0 : index
    %114 = vector.load %arg17[%c0_98, %c0_99, %c0_100] : memref<1x1x2xf32, #tpu.memory_space<vmem>>, vector<1x1x2xf32>
    %115 = vector.shape_cast %114 : vector<1x1x2xf32> to vector<1x2xf32>
    %116 = vector.shape_cast %113 : vector<1x2xf32> to vector<1x1x2xf32>
    tpu.vector_store %arg17[%c0_98, %c0_99, %c0_100], %116 {strides = array<i32>} : memref<1x1x2xf32, #tpu.memory_space<vmem>>, vector<1x1x2xf32>,
    return
  }
  func.func @transform_0(%arg0: i32) -> (i32, i32) {
    %c0_i32 = arith.constant 0 : i32
    %c0_i32_0 = arith.constant 0 : i32
    %c0_i32_1 = arith.constant 0 : i32
    return %c0_i32, %c0_i32_0 : i32, i32
  }
  func.func @transform_1(%arg0: i32) -> (i32, i32, i32) {
    %c0_i32 = arith.constant 0 : i32
    %c0_i32_0 = arith.constant 0 : i32
    %c0_i32_1 = arith.constant 0 : i32
    return %arg0, %c0_i32, %c0_i32_0 : i32, i32, i32
  }
  func.func @transform_2(%arg0: i32) -> (i32, i32, i32) {
    %c0_i32 = arith.constant 0 : i32
    %c0_i32_0 = arith.constant 0 : i32
    %c0_i32_1 = arith.constant 0 : i32
    return %arg0, %c0_i32, %c0_i32_0 : i32, i32, i32
  }
  func.func @transform_3(%arg0: i32) -> (i32, i32, i32) {
    %c0_i32 = arith.constant 0 : i32
    %c0_i32_0 = arith.constant 0 : i32
    %c0_i32_1 = arith.constant 0 : i32
    %c0_i32_2 = arith.constant 0 : i32
    return %c0_i32, %c0_i32_0, %c0_i32_1 : i32, i32, i32
  }
  func.func @transform_4(%arg0: i32) -> (i32, i32, i32) {
    %c0_i32 = arith.constant 0 : i32
    %c0_i32_0 = arith.constant 0 : i32
    %c0_i32_1 = arith.constant 0 : i32
    %c0_i32_2 = arith.constant 0 : i32
    return %c0_i32, %c0_i32_0, %c0_i32_1 : i32, i32, i32
  }
  func.func @transform_5(%arg0: i32) -> (i32, i32) {
    %c0_i32 = arith.constant 0 : i32
    %c0_i32_0 = arith.constant 0 : i32
    %c0_i32_1 = arith.constant 0 : i32
    return %c0_i32, %c0_i32_0 : i32, i32
  }
  func.func @transform_6(%arg0: i32) -> (i32, i32, i32) {
    %c0_i32 = arith.constant 0 : i32
    %c0_i32_0 = arith.constant 0 : i32
    %c0_i32_1 = arith.constant 0 : i32
    %c0_i32_2 = arith.constant 0 : i32
    return %c0_i32, %c0_i32_0, %c0_i32_1 : i32, i32, i32
  }
  func.func @transform_7(%arg0: i32) -> (i32, i32, i32) {
    %c0_i32 = arith.constant 0 : i32
    %c0_i32_0 = arith.constant 0 : i32
    %c0_i32_1 = arith.constant 0 : i32
    %c0_i32_2 = arith.constant 0 : i32
    return %c0_i32, %c0_i32_0, %c0_i32_1 : i32, i32, i32
  }
  func.func @transform_8(%arg0: i32) -> (i32, i32) {
    %c0_i32 = arith.constant 0 : i32
    %c0_i32_0 = arith.constant 0 : i32
    %c0_i32_1 = arith.constant 0 : i32
    return %c0_i32, %c0_i32_0 : i32, i32
  }
  func.func @transform_9(%arg0: i32) -> (i32, i32, i32) {
    %c0_i32 = arith.constant 0 : i32
    %c0_i32_0 = arith.constant 0 : i32
    %c0_i32_1 = arith.constant 0 : i32
    %c0_i32_2 = arith.constant 0 : i32
    return %c0_i32, %c0_i32_0, %c0_i32_1 : i32, i32, i32
  }
  func.func @transform_10(%arg0: i32) -> (i32, i32, i32) {
    %c0_i32 = arith.constant 0 : i32
    %c0_i32_0 = arith.constant 0 : i32
    %c0_i32_1 = arith.constant 0 : i32
    %c0_i32_2 = arith.constant 0 : i32
    return %c0_i32, %c0_i32_0, %c0_i32_1 : i32, i32, i32
  }
  func.func @transform_11(%arg0: i32) -> (i32, i32) {
    %c0_i32 = arith.constant 0 : i32
    %c0_i32_0 = arith.constant 0 : i32
    %c0_i32_1 = arith.constant 0 : i32
    return %c0_i32, %c0_i32_0 : i32, i32
  }
  func.func @transform_12(%arg0: i32) -> (i32, i32) {
    %c0_i32 = arith.constant 0 : i32
    %c0_i32_0 = arith.constant 0 : i32
    %c0_i32_1 = arith.constant 0 : i32
    return %c0_i32, %c0_i32_0 : i32, i32
  }
  func.func @transform_13(%arg0: i32) -> (i32, i32) {
    %c0_i32 = arith.constant 0 : i32
    %c0_i32_0 = arith.constant 0 : i32
    %c0_i32_1 = arith.constant 0 : i32
    return %c0_i32, %c0_i32_0 : i32, i32
  }
  func.func @transform_14(%arg0: i32) -> (i32, i32) {
    %c0_i32 = arith.constant 0 : i32
    %c0_i32_0 = arith.constant 0 : i32
    %c0_i32_1 = arith.constant 0 : i32
    return %c0_i32, %c0_i32_0 : i32, i32
  }
  func.func @transform_15(%arg0: i32) -> (i32, i32) {
    %c0_i32 = arith.constant 0 : i32
    %c0_i32_0 = arith.constant 0 : i32
    %c0_i32_1 = arith.constant 0 : i32
    return %c0_i32, %c0_i32_0 : i32, i32
  }
  func.func @transform_16(%arg0: i32) -> (i32, i32, i32) {
    %c0_i32 = arith.constant 0 : i32
    %c0_i32_0 = arith.constant 0 : i32
    %c0_i32_1 = arith.constant 0 : i32
    return %arg0, %c0_i32, %c0_i32_0 : i32, i32, i32
  }
}

</mosaic_0001>

<bundles_post_ra>
// kernel: forward.1
= control target key start
LH: loop header
LB: loop body
LE: loop exit
PB: predicated region body
PF: predicated region fallthrough
CT: control target
= control target key end

     0   :  { %s4301_s0 = inlined_call_operand.<no memory space> [shape: f32[1,1], index: 0, kind: input, shape index: {}]   ;;  %s4302_s1 = inlined_call_operand.vmem [shape: f32[2,16,48], index: 1, kind: input, shape index: {}]   ;;  %s4303_s2 = inlined_call_operand.vmem [shape: f32[2,16,48], index: 2, kind: input, shape index: {}]   ;;  %s4304_s3 = inlined_call_operand.vmem [shape: bf16[3,7,16], index: 3, kind: input, shape index: {}]   ;;  %s4305_s4 = inlined_call_operand.vmem [shape: bf16[3,48,224], index: 4, kind: input, shape index: {}]   ;;  %s4306_s5 = inlined_call_operand.vmem [shape: f32[1,224], index: 5, kind: input, shape index: {}]   ;;  %s4307_s6 = inlined_call_operand.vmem [shape: bf16[3,3,7], index: 6, kind: input, shape index: {}]   ;;  %s4308_s7 = inlined_call_operand.vmem [shape: bf16[3,224,192], index: 7, kind: input, shape index: {}]   ;;  %s4309_s8 = inlined_call_operand.vmem [shape: f32[1,192], index: 8, kind: input, shape index: {}]   ;;  %s4310_s9 = inlined_call_operand.vmem [shape: bf16[3,1,3], index: 9, kind: input, shape index: {}]   ;;  %s4311_s10 = inlined_call_operand.vmem [shape: bf16[3,192,128], index: 10, kind: input, shape index: {}]   ;;  %s4312_s11 = inlined_call_operand.vmem [shape: f32[1,128], index: 11, kind: input, shape index: {}]   ;;  %s4313_s12 = inlined_call_operand.vmem [shape: bf16[128,256], index: 12, kind: input, shape index: {}]   ;;  %s4314_s13 = inlined_call_operand.vmem [shape: f32[1,256], index: 13, kind: input, shape index: {}]   ;;  %s4315_s14 = inlined_call_operand.vmem [shape: bf16[256,2], index: 14, kind: input, shape index: {}]   ;;  %s4316_s15 = inlined_call_operand.vmem [shape: f32[1,2], index: 15, kind: input, shape index: {}]   ;;  %s4317_s16 = inlined_call_operand.hbm [shape: f32[2,1,2], index: 16, kind: output, shape index: {}]  }
   0x1   :  { %4324 = sst [smem:[#allocation12_spill]] %s4301_s0 }
   0x2   :  { %s4325_s23 = sld [smem:[#allocation12_spill]] }
   0x8   :  { %21 = sst [smem:[#allocation2]] %s4325_s23 }
   0x9   :  { %22 = vsyncpa [#allocation4], 0 }
   0xa   :  { %24 = vsyncpa [#allocation4 + $0x1], 0  ;;  %s3558_s24 = smov 0   ;;  %s3560_s25 = smov 0  }
   0xb   :  { %s3562_s26 = smov 0   ;;  %s3564_s27 = smov 0  }
   0xc LB: > { %4326 = sst [smem:[#allocation6_spill]] %s3451_s24  ;;  %s3579_s28 = sadd.s32 4294967295, %s3463_s27   ;;  %s3463_s27 = sphi %s3564_s27, %s4337_s27   ;;  %s3459_s26 = sphi %s3562_s26, %s4339_s26   ;;  %s3455_s25 = sphi %s3560_s25, %s4341_s25   ;;  %s3451_s24 = sphi %s3558_s24, %s4340_s24  }
   0xd   : > { %4327 = sst [smem:[#allocation7_spill]] %s3459_s26  ;;  %s2762_s29 = sadd.s32 4294967294, %s3463_s27  }
   0xe   : > { %4328 = sst [smem:[#allocation8_spill]] %s3463_s27  ;;  %s3583_s30 = sadd.s32 1, %s3463_s27  }
   0xf   : > { %4329 = sst [smem:[#allocation9_spill]] %s3583_s30  ;;  %s383_s0 = sadd.s32 1, %s3459_s26 }
  0x10   : > { %s380_s17 = ssub.s32 %s3463_s27, %s3583_s30  ;;  %p393_p0 = scmp.ne.s32.totalorder %s3459_s26, %s3455_s25 }
  0x11   : > { %p381_p1 = scmp.eq.s32.totalorder %s380_s17, 0  ;;  %p394_p2 = scmp.eq.s32.totalorder %s3579_s28, 1 }
  0x12   : > { %p399_p3 = scmp.ne.s32.totalorder %s3455_s25, %s3451_s24  ;;  %p400_p4 = scmp.eq.s32.totalorder %s2762_s29, 1 }
  0x13   : > { %s3594_s18 = scalar_select %p381_p1, %s3459_s26, %s383_s0  }
  0x14   : > { %p3596_p5 = por %p394_p2, %p393_p0  ;;  %p3600_p6 = por %p400_p4, %p399_p3 }
  0x15   : > { %4330 = sst [smem:[#allocation10_spill]] %s3594_s18  ;;  %p2765_p7 = scmp.ge.s32.totalorder %s3463_s27, 1 }
  0x16   : > { %s4332_s20 = scalar_select %p3600_p6, 1, 0 }
  0x17   : > { %p476_p8 = scmp.lt.s32.totalorder %s3463_s27, 3 }
  0x18   : > { %4333 = sst [smem:[#allocation11_spill]] %s4332_s20 }
  0x19   : > { %p477_p9 = pnand %p2765_p7, %p476_p8 }
  0x1a   : > { %p530_p10 = scmp.lt.s32.totalorder (!%p477_p9), %s3579_s28, 1  ;;  %s541_s21 = sld [smem:[#allocation2]] (!%p477_p9) }
  0x1b   : > { %480 = sbr.rel (%p477_p9) target bundleno = 2132 (0x854), region = 84  ;;  %s3080_s29 = sshll.u32 (!%p477_p9), %s3579_s28, 4 }
  0x20   : > { %v3465_v0 = vmov 0.0   ;;  %s531_s22 = scalar_select %p530_p10, %s3579_s28, 1  ;;  %vm3466_vm0 = vmmov 0   ;;  %v546_v3 = vstv %s541_s21  ;;  %v3176_v9 = vld [vmem:[%s4305_s4 + $0x24] ss:$8 sps:$4 sm:$0xff]   ;;  %vm554_vm1 = vcmask 130048  }
  0x21   : > { %3113 = vmatprep.subr.bf16.mxu1 %v3465_v0  ;;  %3119 = vmatprep.subr.bf16.mxu0 %v3465_v0  ;;  %v3179_v10 = vld [vmem:[%s4305_s4 + $0x54] ss:$8 sps:$4 sm:$0xff]   ;;  %v553_v13 = vld [vmem:[%s4304_s3] sm:$0xf]  ;;  %v2778_v14 = vld [vmem:[%s4304_s3 + $0x4] sm:$0xf]  ;;  %v681_v43 = vlaneseq }
  0x22   : > { %3115 = vmatprep.mubr.msk.bf16.mxu1 %vm3466_vm0, %v3465_v0  ;;  %3121 = vmatprep.mubr.msk.bf16.mxu0 %vm3466_vm0, %v3465_v0  ;;  %s3083_s23 = sshll.u32 %s531_s22, 4  ;;  %v3174_v15 = vld [vmem:[%s4305_s4 + $0x20] ss:$8 sps:$4 sm:$0xff]   ;;  %v3177_v16 = vld [vmem:[%s4305_s4 + $0x50] ss:$8 sps:$4 sm:$0xff]   ;;  %v3467_v25 = vmov 0  }
  0x23   : > { %s534_s17 = scalar_lea.vmem %s4302_s1, %s3083_s23  ;;  %s539_s30 = scalar_lea.vmem %s4303_s2, %s3083_s23  ;;  %v3182_v17 = vld [vmem:[%s4305_s4 + $0x14] ss:$8 sps:$4 sm:$0xff]   ;;  %v3185_v18 = vld [vmem:[%s4305_s4 + $0x44] ss:$8 sps:$4 sm:$0xff]   ;;  %v3180_v19 = vld [vmem:[%s4305_s4 + $0x10] ss:$8 sps:$4 sm:$0xff]  }
  0x24   : > { %v542_v1 = vld [vmem:[%s534_s17] sm:$0xff]  ;;  %v543_v4 = vld [vmem:[%s534_s17 + $0x8] sm:$0xff]  ;;  %v3191_v23 = vld [vmem:[%s4305_s4 + $0x34] ss:$8 sps:$4 sm:$0xff]   ;;  %vm635_vm2 = vcmask 392192   ;;  %v682_v44 = vshrl.u32 %v681_v43, 7  ;;  %s4266_s17 = scalar_lea.hbm %s4317_s16, %s3080_s29 }
  0x25   : > { %v544_v2 = vld [vmem:[%s539_s30] sm:$0xff]  ;;  %v545_v5 = vld [vmem:[%s539_s30 + $0x8] sm:$0xff]  ;;  %v3189_v24 = vld [vmem:[%s4305_s4 + $0x30] ss:$8 sps:$4 sm:$0xff]   ;;  %vm963_vm3 = vcmask 1042432   ;;  %vm964_vm4 = vcmask 1043456  }
  0x26   : > { %v547_v6 = vmul.f32 %v546_v3, %v544_v2  ;;  %v548_v7 = vmul.f32 %v546_v3, %v545_v5  ;;  %v3183_v20 = vld [vmem:[%s4305_s4 + $0x40] ss:$8 sps:$4 sm:$0xff]   ;;  %v3188_v21 = vld [vmem:[%s4305_s4 + $0x4] ss:$8 sps:$4 sm:$0xff]   ;;  %v3197_v39 = vld [vmem:[%s4305_s4 + $0x74] ss:$8 sps:$4 sm:$0xff]  }
  0x27   : > { %v3186_v22 = vld [vmem:[%s4305_s4] ss:$8 sps:$4 sm:$0xff]   ;;  %v3194_v30 = vld [vmem:[%s4305_s4 + $0x84] ss:$8 sps:$4 sm:$0xff]   ;;  %v3195_v40 = vld [vmem:[%s4305_s4 + $0x70] ss:$8 sps:$4 sm:$0xff]  }
  0x28   : > { %v549_v8 = vadd.f32 %v547_v6, %v542_v1  ;;  %v550_v11 = vadd.f32 %v548_v7, %v543_v4  ;;  %v2793_v37 = vld [vmem:[%s4304_s3 + $0x8] sm:$0xf]  ;;  %v3200_v41 = vld [vmem:[%s4305_s4 + $0x64] ss:$8 sps:$4 sm:$0xff]   ;;  %v3695_v45 = vsub.s32 0, %v682_v44  ;;  %v3700_v47 = vsub.s32 1, %v682_v44 }
  0x29   : > { %v3192_v38 = vld [vmem:[%s4305_s4 + $0x80] ss:$8 sps:$4 sm:$0xff]   ;;  %vm959_vm5 = vcmask 56320   ;;  %v3218_v43 = vld [vmem:[%s4308_s7 + $0x24] ss:$8 sps:$4 sm:$0xff]   ;;  %vm1184_vm6 = vcmask 785408  }
  0x2a   : > { %v551_v12 = vpack.c.bf16 %v550_v11, %v549_v8  ;;  %v3198_v42 = vld [vmem:[%s4305_s4 + $0x60] ss:$8 sps:$4 sm:$0xff]   ;;  %v3468_v11 = vmov 65535   ;;  %v3260_v44 = vld [vmem:[%s4308_s7 + $0x104] ss:$8 sps:$4 sm:$0xff]   ;;  %vm1780_vm7 = vcmask 1040384  }
  0x2b   : > { %v552_v46 = vld [vmem:[%s4306_s5] sm:$0x3]  ;;  %vm1781_vm8 = vcmask 1041408   ;;  %vm1776_vm9 = vcmask 23552   ;;  %vm1929_vm10 = vcmask 523264   ;;  %s528_s21 = sand.u32 1, %s3455_s25  }
  0x2c   : > { %3114 = vmatpush3.bf16.msra.mxu1 %v551_v12  ;;  %3120 = vmatpush3.bf16.msra.mxu0 %v551_v12  ;;  %v684_v48 = vrot.slane %v552_v46, %v3695_v45  ;;  %v688_v49 = vrot.slane %v552_v46, %v3700_v47  ;;  %v3216_v46 = vld [vmem:[%s4308_s7 + $0x20] ss:$8 sps:$4 sm:$0xff]   ;;  %s529_s24 = scalar_lea.vmem [#allocation3], %s528_s21  ;;  %vm2680_vm11 = vcmask 8192   ;;  %s2683_s22 = scalar_lea.sflag [#allocation4], %s528_s21 }
  0x2d   : > { %649 = vmatprep.subr.bf16.mxu1 %v3176_v9  ;;  %789 = vmatprep.subr.bf16.mxu0 %v3179_v10  ;;  %s2695_s20 = sshll.u32 %s529_s24, 4  ;;  %s3469_s28 = smov [#allocation3]   ;;  %s2696_s20 = int_to_ptr.vmem [resolvable:$true] %s2695_s20 }
  0x2e   : > { %s3403_s26 = scalar_lea.vmem %s2696_s20, 16  ;;  %s3407_s18 = sshll.u32 %s3469_s28, 4  ;;  %s3408_s18 = int_to_ptr.vmem [resolvable:$false] %s3407_s18 }
  0x2f   : > { %3116 = vmatmul.mubr.msk.bf16.vlgmr.msra.gmra.mxu1 %vm554_vm1, %v553_v13  ;;  %3122 = vmatmul.mubr.msk.bf16.vlgmr.msra.gmra.mxu0 %vm554_vm1, %v2778_v14  ;;  %p3404_p11 = scmp.ne.s32.totalorder %s2696_s20, %s3403_s26  ;;  %s3409_s23 = scalar_lea.vmem %s3408_s18, 32 }
  0x30   : > { %650 = vmatpush1.bf16.msra.mxu1 %v3174_v15  ;;  %790 = vmatpush1.bf16.msra.mxu0 %v3177_v16  ;;  %p3410_p0 = scmp.lt.s32.totalorder %s2696_s20, %s3408_s18  ;;  %p3411_p1 = scmp.lt.s32.totalorder %s3409_s23, %s3403_s26 }
  0x31   : > { %651 = vmatprep.subr.bf16.mxu1 %v3182_v17  ;;  %791 = vmatprep.subr.bf16.mxu0 %v3185_v18  ;;  %p3405_p12 = pnand %p3404_p11, %p3596_p5 }
  0x32   : > { %671 = vmatprep.mubr.bf16.mxu1 %v3467_v25  ;;  %811 = vmatprep.mubr.bf16.mxu0 %v3467_v25  ;;  %p3412_p2 = por %p3411_p1, %p3410_p0 }
  0x33   : > { %p3406_p13 = pneg %p3405_p12 }
  0x34   : > { %652 = vmatpush1.bf16.msra.mxu1 %v3180_v19  ;;  %792 = vmatpush1.bf16.msra.mxu0 %v3183_v20  ;;  %v3203_v19 = vld [vmem:[%s4308_s7 + $0x74] ss:$8 sps:$4 sm:$0xff]  }
  0x35   : > { %653 = vmatprep.subr.bf16.mxu1 %v3188_v21  ;;  %793 = vmatprep.subr.bf16.mxu0 %v3191_v23  ;;  %v3245_v20 = vld [vmem:[%s4308_s7 + $0x154] ss:$8 sps:$4 sm:$0xff]   ;;  %v3201_v23 = vld [vmem:[%s4308_s7 + $0x70] ss:$8 sps:$4 sm:$0xff]   ;;  %p3413_p3 = pnand %p3412_p2, %p3406_p13 }
  0x38   : > { %654 = vmatpush1.bf16.msra.mxu1 %v3186_v22  ;;  %794 = vmatpush1.bf16.msra.mxu0 %v3189_v24  ;;  %v958_v22 = vld [vmem:[%s4307_s6] sm:$0x3]  ;;  %v2838_v24 = vld [vmem:[%s4307_s6 + $0x2] sm:$0x3] }
  0x39   : > { %3125 = vmatprep.subr.bf16.mxu1 %v3465_v0 }
  0xef   : > { %v592_v26 = vpop.f32.mrf.mxu1  ;;  %v732_v27 = vpop.f32.mrf.mxu0 }
  0xf0   : > { %v598_v28 = vpack.c.bf16 %v592_v26, %v592_v26  ;;  %v738_v29 = vpack.c.bf16 %v732_v27, %v732_v27  ;;  %v3243_v26 = vld [vmem:[%s4308_s7 + $0x150] ss:$8 sps:$4 sm:$0xff]   ;;  %v3206_v27 = vld [vmem:[%s4308_s7 + $0x64] ss:$8 sps:$4 sm:$0xff]  }
  0xf1   : > { %v3117_v31 = vpop.f32.mrf.mxu1  ;;  %v3123_v32 = vpop.f32.mrf.mxu0 }
  0xf2   : > { %2777 = vmatmul.mubr.msk.bf16.vlgmr.msra.gmra.mxu1 %vm635_vm2, %v598_v28  ;;  %2792 = vmatmul.mubr.msk.bf16.vlgmr.msra.gmra.mxu0 %vm635_vm2, %v738_v29  ;;  %v3248_v28 = vld [vmem:[%s4308_s7 + $0x144] ss:$8 sps:$4 sm:$0xff]   ;;  %v3204_v29 = vld [vmem:[%s4308_s7 + $0x60] ss:$8 sps:$4 sm:$0xff]   ;;  %v3209_v31 = vld [vmem:[%s4308_s7 + $0x54] ss:$8 sps:$4 sm:$0xff]  }
  0xf3   : > { %v595_v33 = vpop.f32.mrf.mxu1  ;;  %3126 = vmatpush3.bf16.msra.mxu1 %v551_v12  ;;  %3127 = vmatprep.mubr.msk.bf16.mxu1 %vm3466_vm0, %v3465_v0  ;;  %v735_v34 = vpop.f32.mrf.mxu0  ;;  %v965_v12 = vsel %vm963_vm3, 4294967295, %v3468_v11  ;;  %v3251_v32 = vld [vmem:[%s4308_s7 + $0x134] ss:$8 sps:$4 sm:$0xff]  }
  0xf4   : > { %918 = vmatprep.subr.bf16.mxu1 %v3194_v30  ;;  %1005 = vmatprep.mubr.bf16.mxu0 %v3467_v25  ;;  %v966_v16 = vsel %vm964_vm4, %v965_v12, 0  ;;  %v3246_v30 = vld [vmem:[%s4308_s7 + $0x140] ss:$8 sps:$4 sm:$0xff]   ;;  %v3207_v33 = vld [vmem:[%s4308_s7 + $0x50] ss:$8 sps:$4 sm:$0xff]  }
  0xf5   : > { %v3118_v35 = vpop.f32.mrf.mxu1  ;;  %v3124_v36 = vpop.f32.mrf.mxu0  ;;  %v3249_v34 = vld [vmem:[%s4308_s7 + $0x130] ss:$8 sps:$4 sm:$0xff]   ;;  %v3242_v12 = vld [vmem:[%s4308_s7 + $0x84] ss:$8 sps:$4 sm:$0xff]  }
  0xf6   : > { %v3212_v35 = vld [vmem:[%s4308_s7 + $0x44] ss:$8 sps:$4 sm:$0xff]  }
  0xf7   : > { %v3254_v36 = vld [vmem:[%s4308_s7 + $0x124] ss:$8 sps:$4 sm:$0xff]  }
  0xfa   : > { %3128 = vmatmul.mubr.msk.bf16.vlgmr.msra.gmra.mxu1 %vm554_vm1, %v2793_v37  ;;  %v3210_v37 = vld [vmem:[%s4308_s7 + $0x40] ss:$8 sps:$4 sm:$0xff]  }
  0xfb   : > { %919 = vmatpush1.bf16.msra.mxu1 %v3192_v38  ;;  %940 = vmatprep.mubr.bf16.mxu1 %v3467_v25  ;;  %v3252_v38 = vld [vmem:[%s4308_s7 + $0x120] ss:$8 sps:$4 sm:$0xff]  }
  0xfc   : > { %920 = vmatprep.subr.bf16.mxu1 %v3197_v39  ;;  %v3215_v39 = vld [vmem:[%s4308_s7 + $0x34] ss:$8 sps:$4 sm:$0xff]  }
  0xff   : > { %921 = vmatpush1.bf16.msra.mxu1 %v3195_v40  ;;  %v3257_v40 = vld [vmem:[%s4308_s7 + $0x114] ss:$8 sps:$4 sm:$0xff]  }
 0x100   : > { %922 = vmatprep.subr.bf16.mxu1 %v3200_v41  ;;  %v3213_v41 = vld [vmem:[%s4308_s7 + $0x30] ss:$8 sps:$4 sm:$0xff]  }
 0x103   : > { %923 = vmatpush1.bf16.msra.mxu1 %v3198_v42  ;;  %v3255_v42 = vld [vmem:[%s4308_s7 + $0x110] ss:$8 sps:$4 sm:$0xff]  }
 0x1b2   : > { %v673_v50 = vpop.f32.mrf.mxu1  ;;  %v813_v51 = vpop.f32.mrf.mxu0 }
 0x1b3   : > { %v691_v52 = vadd.f32 %v684_v48, %v673_v50  ;;  %v3258_v48 = vld [vmem:[%s4308_s7 + $0x100] ss:$8 sps:$4 sm:$0xff]   ;;  %v3263_v50 = vld [vmem:[%s4308_s7 + $0xf4] ss:$8 sps:$4 sm:$0xff]  }
 0x1b4   : > { %v675_v53 = vpop.f32.mrf.mxu1  ;;  %v815_v54 = vpop.f32.mrf.mxu0 }
 0x1b5   : > { %v692_v55 = vadd.f32 %v688_v49, %v675_v53  ;;  %v820_v56 = vadd.f32 %v813_v51, %v691_v52  ;;  %v3221_v49 = vld [vmem:[%s4308_s7 + $0x14] ss:$8 sps:$4 sm:$0xff]   ;;  %v3219_v51 = vld [vmem:[%s4308_s7 + $0x10] ss:$8 sps:$4 sm:$0xff]   ;;  %v3224_v53 = vld [vmem:[%s4308_s7 + $0x4] ss:$8 sps:$4 sm:$0xff]  }
 0x1b6   : > { %v677_v57 = vpop.f32.mrf.mxu1  ;;  %v817_v58 = vpop.f32.mrf.mxu0  ;;  %v3261_v52 = vld [vmem:[%s4308_s7 + $0xf0] ss:$8 sps:$4 sm:$0xff]  }
 0x1b7   : > { %v821_v59 = vadd.f32 %v815_v54, %v692_v55  ;;  %v3266_v54 = vld [vmem:[%s4308_s7 + $0xe4] ss:$8 sps:$4 sm:$0xff]   ;;  %v3222_v55 = vld [vmem:[%s4308_s7] ss:$8 sps:$4 sm:$0xff]   ;;  %v3227_v57 = vld [vmem:[%s4308_s7 + $0xd4] ss:$8 sps:$4 sm:$0xff]  }
 0x1b8   : > { %v678_v60 = vpop.f32.mrf.mxu1  ;;  %v818_v61 = vpop.f32.mrf.mxu0  ;;  %v3269_v58 = vld [vmem:[%s4308_s7 + $0x1b4] ss:$8 sps:$4 sm:$0xff]  }
 0x1b9   : > { %v3267_v60 = vld [vmem:[%s4308_s7 + $0x1b0] ss:$8 sps:$4 sm:$0xff]   ;;  %v3230_v61 = vld [vmem:[%s4308_s7 + $0xc4] ss:$8 sps:$4 sm:$0xff]  }
 0x1ba   : > { %v861_v62 = vpop.f32.mrf.mxu1 }
 0x1bb   : > { %v867_v63 = vpack.c.bf16 %v861_v62, %v861_v62  ;;  %v3272_v62 = vld [vmem:[%s4308_s7 + $0x1a4] ss:$8 sps:$4 sm:$0xff]  }
 0x1bc   : > { %v3129_v0 = vpop.f32.mrf.mxu1 }
 0x1bd   : > { %2807 = vmatmul.mubr.msk.bf16.vlgmr.msra.gmra.mxu1 %vm635_vm2, %v867_v63  ;;  %v3228_v63 = vld [vmem:[%s4308_s7 + $0xc0] ss:$8 sps:$4 sm:$0xff]  }
 0x1be   : > { %v864_v1 = vpop.f32.mrf.mxu1  ;;  %1279 = vmatprep.mubr.bf16.mxu1 %v3467_v25  ;;  %v3270_v0 = vld [vmem:[%s4308_s7 + $0x1a0] ss:$8 sps:$4 sm:$0xff]  }
 0x1bf   : > { %v3233_v1 = vld [vmem:[%s4308_s7 + $0xb4] ss:$8 sps:$4 sm:$0xff]  }
 0x1c0   : > { %v3130_v2 = vpop.f32.mrf.mxu1 }
 0x1c1   : > { %v3275_v2 = vld [vmem:[%s4308_s7 + $0x194] ss:$8 sps:$4 sm:$0xff]  }
 0x27d   : > { %v942_v3 = vpop.f32.mrf.mxu1 }
 0x27e   : > { %v949_v4 = vadd.f32 %v942_v3, %v820_v56  ;;  %v3264_v56 = vld [vmem:[%s4308_s7 + $0xe0] ss:$8 sps:$4 sm:$0xff]   ;;  %v3231_v3 = vld [vmem:[%s4308_s7 + $0xb0] ss:$8 sps:$4 sm:$0xff]  }
 0x27f   : > { %v944_v5 = vpop.f32.mrf.mxu1 }
 0x280   : > { %v951_v6 = vmul.f32 0.3, %v949_v4  ;;  %v950_v7 = vadd.f32 %v944_v5, %v821_v59  ;;  %v3225_v59 = vld [vmem:[%s4308_s7 + $0xd0] ss:$8 sps:$4 sm:$0xff]   ;;  %v3236_v5 = vld [vmem:[%s4308_s7 + $0xa4] ss:$8 sps:$4 sm:$0xff]  }
 0x281   : > { %v946_v8 = vpop.f32.mrf.mxu1 }
 0x282   : > { %v953_v9 = vmax.f32 %v949_v4, %v951_v6  ;;  %v952_v10 = vmul.f32 0.3, %v950_v7  ;;  %v3273_v4 = vld [vmem:[%s4308_s7 + $0x190] ss:$8 sps:$4 sm:$0xff]   ;;  %v3278_v6 = vld [vmem:[%s4308_s7 + $0x184] ss:$8 sps:$4 sm:$0xff]  }
 0x283   : > { %v947_v13 = vpop.f32.mrf.mxu1  ;;  %v3276_v8 = vld [vmem:[%s4308_s7 + $0x180] ss:$8 sps:$4 sm:$0xff]  }
 0x284   : > { %v954_v14 = vmax.f32 %v950_v7, %v952_v10  ;;  %v955_v15 = vpack.c.bf16 %v953_v9, %v953_v9  ;;  %v3234_v7 = vld [vmem:[%s4308_s7 + $0xa0] ss:$8 sps:$4 sm:$0xff]   ;;  %v3239_v9 = vld [vmem:[%s4308_s7 + $0x94] ss:$8 sps:$4 sm:$0xff]   ;;  %v3237_v10 = vld [vmem:[%s4308_s7 + $0x90] ss:$8 sps:$4 sm:$0xff]  }
 0x285   : > { %v3240_v13 = vld [vmem:[%s4308_s7 + $0x80] ss:$8 sps:$4 sm:$0xff]  }
 0x286   : > { %v956_v17 = vpack.c.bf16 %v954_v14, %v954_v14  ;;  %v3715_v21 = vand.u32 %v966_v16, %v955_v15  ;;  %v3281_v14 = vld [vmem:[%s4308_s7 + $0x174] ss:$8 sps:$4 sm:$0xff]   ;;  %v3279_v15 = vld [vmem:[%s4308_s7 + $0x170] ss:$8 sps:$4 sm:$0xff]  }
 0x288   : > { %v3707_v18 = vand.u32 %v966_v16, %v956_v17  ;;  %v3284_v16 = vld [vmem:[%s4308_s7 + $0x164] ss:$8 sps:$4 sm:$0xff]   ;;  %v3282_v17 = vld [vmem:[%s4308_s7 + $0x160] ss:$8 sps:$4 sm:$0xff]  }
 0x28a   : > { %987 = vmatprep.subr.bf16.mxu0 %v3707_v18  ;;  %1261 = vmatprep.subr.bf16.mxu1 %v3707_v18 }
 0x28b   : > { %988 = vmatpush1.bf16.msra.mxu0 %v3715_v21  ;;  %1262 = vmatpush1.bf16.msra.mxu1 %v3715_v21 }
 0x28c   : > { %1188 = vmatprep.subr.bf16.mxu0 %v3203_v19  ;;  %1462 = vmatprep.subr.bf16.mxu1 %v3245_v20 }
 0x28e   : > { %2808 = vmatmul.mubr.msk.bf16.vlgmr.msra.gmra.mxu0 %vm959_vm5, %v958_v22  ;;  %2839 = vmatmul.mubr.msk.bf16.vlgmr.msra.gmra.mxu1 %vm959_vm5, %v2838_v24 }
 0x28f   : > { %1189 = vmatpush1.bf16.msra.mxu0 %v3201_v23  ;;  %1463 = vmatpush1.bf16.msra.mxu1 %v3243_v26 }
 0x290   : > { %1190 = vmatprep.subr.bf16.mxu0 %v3206_v27  ;;  %1464 = vmatprep.subr.bf16.mxu1 %v3248_v28 }
 0x293   : > { %1191 = vmatpush1.bf16.msra.mxu0 %v3204_v29  ;;  %1465 = vmatpush1.bf16.msra.mxu1 %v3246_v30  ;;  %v3287_v29 = vld [vmem:[%s4308_s7 + $0x234] ss:$8 sps:$4 sm:$0xff]  }
 0x294   : > { %1192 = vmatprep.subr.bf16.mxu0 %v3209_v31  ;;  %1466 = vmatprep.subr.bf16.mxu1 %v3251_v32 }
 0x297   : > { %1193 = vmatpush1.bf16.msra.mxu0 %v3207_v33  ;;  %1467 = vmatpush1.bf16.msra.mxu1 %v3249_v34  ;;  %v2897_v33 = vld [vmem:[%s4307_s6 + $0x4] sm:$0x3]  ;;  %v3285_v34 = vld [vmem:[%s4308_s7 + $0x230] ss:$8 sps:$4 sm:$0xff]  }
 0x298   : > { %1194 = vmatprep.subr.bf16.mxu0 %v3212_v35  ;;  %1468 = vmatprep.subr.bf16.mxu1 %v3254_v36  ;;  %v3290_v35 = vld [vmem:[%s4308_s7 + $0x224] ss:$8 sps:$4 sm:$0xff]   ;;  %v3293_v36 = vld [vmem:[%s4308_s7 + $0x214] ss:$8 sps:$4 sm:$0xff]  }
 0x29b   : > { %1195 = vmatpush1.bf16.msra.mxu0 %v3210_v37  ;;  %1469 = vmatpush1.bf16.msra.mxu1 %v3252_v38  ;;  %v3291_v37 = vld [vmem:[%s4308_s7 + $0x210] ss:$8 sps:$4 sm:$0xff]   ;;  %v3296_v38 = vld [vmem:[%s4308_s7 + $0x204] ss:$8 sps:$4 sm:$0xff]  }
 0x29c   : > { %1196 = vmatprep.subr.bf16.mxu0 %v3215_v39  ;;  %1470 = vmatprep.subr.bf16.mxu1 %v3257_v40  ;;  %v3294_v39 = vld [vmem:[%s4308_s7 + $0x200] ss:$8 sps:$4 sm:$0xff]   ;;  %v3299_v40 = vld [vmem:[%s4308_s7 + $0x1f4] ss:$8 sps:$4 sm:$0xff]  }
 0x29f   : > { %1197 = vmatpush1.bf16.msra.mxu0 %v3213_v41  ;;  %1471 = vmatpush1.bf16.msra.mxu1 %v3255_v42  ;;  %v3297_v41 = vld [vmem:[%s4308_s7 + $0x1f0] ss:$8 sps:$4 sm:$0xff]   ;;  %v3302_v42 = vld [vmem:[%s4308_s7 + $0x1e4] ss:$8 sps:$4 sm:$0xff]  }
 0x2a0   : > { %1198 = vmatprep.subr.bf16.mxu0 %v3218_v43  ;;  %1472 = vmatprep.subr.bf16.mxu1 %v3260_v44  ;;  %v3300_v43 = vld [vmem:[%s4308_s7 + $0x1e0] ss:$8 sps:$4 sm:$0xff]   ;;  %v3305_v44 = vld [vmem:[%s4308_s7 + $0x1d4] ss:$8 sps:$4 sm:$0xff]  }
 0x2a3   : > { %1199 = vmatpush1.bf16.msra.mxu0 %v3216_v46  ;;  %1473 = vmatpush1.bf16.msra.mxu1 %v3258_v48  ;;  %v3303_v46 = vld [vmem:[%s4308_s7 + $0x1d0] ss:$8 sps:$4 sm:$0xff]   ;;  %v3308_v48 = vld [vmem:[%s4308_s7 + $0x1c4] ss:$8 sps:$4 sm:$0xff]  }
 0x2a4   : > { %1200 = vmatprep.subr.bf16.mxu0 %v3221_v49  ;;  %1474 = vmatprep.subr.bf16.mxu1 %v3263_v50  ;;  %v3306_v49 = vld [vmem:[%s4308_s7 + $0x1c0] ss:$8 sps:$4 sm:$0xff]   ;;  %v3311_v50 = vld [vmem:[%s4308_s7 + $0x294] ss:$8 sps:$4 sm:$0xff]  }
 0x2a7   : > { %1201 = vmatpush1.bf16.msra.mxu0 %v3219_v51  ;;  %1475 = vmatpush1.bf16.msra.mxu1 %v3261_v52  ;;  %v3309_v51 = vld [vmem:[%s4308_s7 + $0x290] ss:$8 sps:$4 sm:$0xff]   ;;  %v3314_v52 = vld [vmem:[%s4308_s7 + $0x284] ss:$8 sps:$4 sm:$0xff]  }
 0x2a8   : > { %1202 = vmatprep.subr.bf16.mxu0 %v3224_v53  ;;  %1476 = vmatprep.subr.bf16.mxu1 %v3266_v54  ;;  %v3312_v53 = vld [vmem:[%s4308_s7 + $0x280] ss:$8 sps:$4 sm:$0xff]   ;;  %v3317_v54 = vld [vmem:[%s4308_s7 + $0x274] ss:$8 sps:$4 sm:$0xff]  }
 0x2ab   : > { %1203 = vmatpush1.bf16.msra.mxu0 %v3222_v55  ;;  %1477 = vmatpush1.bf16.msra.mxu1 %v3264_v56  ;;  %v3315_v55 = vld [vmem:[%s4308_s7 + $0x270] ss:$8 sps:$4 sm:$0xff]   ;;  %v3320_v56 = vld [vmem:[%s4308_s7 + $0x264] ss:$8 sps:$4 sm:$0xff]  }
 0x2ac   : > { %1208 = vmatprep.subr.bf16.mxu0 %v3227_v57  ;;  %1482 = vmatprep.subr.bf16.mxu1 %v3269_v58  ;;  %v3318_v57 = vld [vmem:[%s4308_s7 + $0x260] ss:$8 sps:$4 sm:$0xff]   ;;  %v3323_v58 = vld [vmem:[%s4308_s7 + $0x254] ss:$8 sps:$4 sm:$0xff]  }
 0x2af   : > { %1209 = vmatpush2.bf16.msra.mxu0 %v3225_v59  ;;  %1483 = vmatpush2.bf16.msra.mxu1 %v3267_v60  ;;  %v3321_v59 = vld [vmem:[%s4308_s7 + $0x250] ss:$8 sps:$4 sm:$0xff]   ;;  %v3326_v60 = vld [vmem:[%s4308_s7 + $0x244] ss:$8 sps:$4 sm:$0xff]  }
 0x2b0   : > { %1210 = vmatprep.subr.bf16.mxu0 %v3230_v61  ;;  %1484 = vmatprep.subr.bf16.mxu1 %v3272_v62  ;;  %v3324_v61 = vld [vmem:[%s4308_s7 + $0x240] ss:$8 sps:$4 sm:$0xff]  }
 0x2b1   : > { %v957_v62 = vld [vmem:[%s4309_s8] sm:$0x3] }
 0x2b3   : > { %1211 = vmatpush2.bf16.msra.mxu0 %v3228_v63  ;;  %1485 = vmatpush2.bf16.msra.mxu1 %v3270_v0  ;;  %v1233_v63 = vrot.slane %v957_v62, %v3695_v45  ;;  %v1237_v0 = vrot.slane %v957_v62, %v3700_v47  ;;  %v3357_v62 = vld [vmem:[%s4311_s10 + $0x110] sm:$0xff]  }
 0x2b4   : > { %1212 = vmatprep.subr.bf16.mxu0 %v3233_v1  ;;  %1486 = vmatprep.subr.bf16.mxu1 %v3275_v2 }
 0x2b7   : > { %1213 = vmatpush2.bf16.msra.mxu0 %v3231_v3  ;;  %1487 = vmatpush2.bf16.msra.mxu1 %v3273_v4 }
 0x2b8   : > { %1214 = vmatprep.subr.bf16.mxu0 %v3236_v5  ;;  %1488 = vmatprep.subr.bf16.mxu1 %v3278_v6 }
 0x2bb   : > { %1215 = vmatpush2.bf16.msra.mxu0 %v3234_v7  ;;  %1489 = vmatpush2.bf16.msra.mxu1 %v3276_v8 }
 0x2bc   : > { %1216 = vmatprep.subr.bf16.mxu0 %v3239_v9  ;;  %1490 = vmatprep.subr.bf16.mxu1 %v3281_v14 }
 0x2bf   : > { %1217 = vmatpush2.bf16.msra.mxu0 %v3237_v10  ;;  %1491 = vmatpush2.bf16.msra.mxu1 %v3279_v15 }
 0x2c0   : > { %1218 = vmatprep.subr.bf16.mxu0 %v3242_v12  ;;  %1492 = vmatprep.subr.bf16.mxu1 %v3284_v16 }
 0x2c3   : > { %1219 = vmatpush2.bf16.msra.mxu0 %v3240_v13  ;;  %1493 = vmatpush2.bf16.msra.mxu1 %v3282_v17 }
 0x2c4   : > { %1524 = vmatprep.subr.bf16.mxu0 %v3707_v18 }
 0x34e   : > { %v1007_v18 = vpop.f32.mrf.mxu0  ;;  %v1281_v19 = vpop.f32.mrf.mxu1 }
 0x34f   : > { %v1288_v22 = vpack.c.bf16 %v1281_v19, %v1281_v19  ;;  %v1014_v27 = vpack.c.bf16 %v1007_v18, %v1007_v18 }
 0x350   : > { %v1009_v20 = vpop.f32.mrf.mxu0  ;;  %v1283_v23 = vpop.f32.mrf.mxu1 }
 0x351   : > { %v1015_v24 = vpack.c.bf16 %v1009_v20, %v1009_v20  ;;  %v1289_v26 = vpack.c.bf16 %v1283_v23, %v1283_v23 }
 0x352   : > { %v1011_v28 = vpop.f32.mrf.mxu0  ;;  %v1285_v30 = vpop.f32.mrf.mxu1 }
 0x353   : > { %2837 = vmatprep.mubr.msk.bf16.mxu0 %vm1184_vm6, %v1015_v24  ;;  %2896 = vmatprep.mubr.msk.bf16.mxu1 %vm1184_vm6, %v1289_v26  ;;  %v1782_v30 = vsel %vm1780_vm7, 4294967295, %v3468_v11  ;;  %v2970_v11 = vld [vmem:[%s4310_s9 + $0x1] sm:$0x1] }
 0x354   : > { %v1012_v31 = vpop.f32.mrf.mxu0  ;;  %1221 = vmatmul.mubr.bf16.vlgmr.msra.gmra.mxu0 %v1014_v27  ;;  %1495 = vmatmul.mubr.bf16.vlgmr.msra.gmra.mxu1 %v1288_v22  ;;  %v1286_v32 = vpop.f32.mrf.mxu1 }
 0x355   : > { %1525 = vmatpush1.bf16.msra.mxu0 %v3715_v21  ;;  %1542 = vmatprep.mubr.bf16.mxu0 %v3467_v25  ;;  %v3288_v21 = vld [vmem:[%s4308_s7 + $0x220] ss:$8 sps:$4 sm:$0xff]  }
 0x356   : > { %1725 = vmatprep.subr.bf16.mxu0 %v3287_v29  ;;  %1822 = vmatprep.mubr.bf16.mxu1 %v3467_v25 }
 0x35c   : > { %2898 = vmatmul.mubr.msk.bf16.vlgmr.msra.gmra.mxu0 %vm959_vm5, %v2897_v33 }
 0x35d   : > { %1726 = vmatpush1.bf16.msra.mxu0 %v3285_v34  ;;  %v1783_v34 = vsel %vm1781_vm8, %v1782_v30, 0  ;;  %v3358_v30 = vld [vmem:[%s4311_s10 + $0xb0] sm:$0xff]  }
 0x35e   : > { %1727 = vmatprep.subr.bf16.mxu0 %v3290_v35 }
 0x361   : > { %1728 = vmatpush1.bf16.msra.mxu0 %v3288_v21 }
 0x362   : > { %1729 = vmatprep.subr.bf16.mxu0 %v3293_v36 }
 0x365   : > { %1730 = vmatpush1.bf16.msra.mxu0 %v3291_v37  ;;  %v1775_v37 = vld [vmem:[%s4310_s9] sm:$0x1] }
 0x366   : > { %1731 = vmatprep.subr.bf16.mxu0 %v3296_v38  ;;  %v3327_v38 = vld [vmem:[%s4311_s10 + $0x38] sm:$0xff]  }
 0x369   : > { %1732 = vmatpush1.bf16.msra.mxu0 %v3294_v39  ;;  %v3328_v39 = vld [vmem:[%s4311_s10 + $0x30] sm:$0xff]  }
 0x36a   : > { %1733 = vmatprep.subr.bf16.mxu0 %v3299_v40  ;;  %v3009_v40 = vld [vmem:[%s4310_s9 + $0x2] sm:$0x1] }
 0x36d   : > { %1734 = vmatpush1.bf16.msra.mxu0 %v3297_v41  ;;  %v3329_v41 = vld [vmem:[%s4311_s10 + $0x28] sm:$0xff]  }
 0x36e   : > { %1735 = vmatprep.subr.bf16.mxu0 %v3302_v42  ;;  %v3330_v42 = vld [vmem:[%s4311_s10 + $0x20] sm:$0xff]  }
 0x371   : > { %1736 = vmatpush1.bf16.msra.mxu0 %v3300_v43  ;;  %v3331_v43 = vld [vmem:[%s4311_s10 + $0x18] sm:$0xff]  }
 0x372   : > { %1737 = vmatprep.subr.bf16.mxu0 %v3305_v44  ;;  %v3332_v44 = vld [vmem:[%s4311_s10 + $0x10] sm:$0xff]  }
 0x375   : > { %1738 = vmatpush1.bf16.msra.mxu0 %v3303_v46  ;;  %v3333_v46 = vld [vmem:[%s4311_s10 + $0x8] sm:$0xff]  }
 0x376   : > { %1739 = vmatprep.subr.bf16.mxu0 %v3308_v48  ;;  %v3334_v48 = vld [vmem:[%s4311_s10] sm:$0xff]  }
 0x379   : > { %1740 = vmatpush1.bf16.msra.mxu0 %v3306_v49  ;;  %v3335_v49 = vld [vmem:[%s4311_s10 + $0x58] sm:$0xff]  }
 0x37a   : > { %1745 = vmatprep.subr.bf16.mxu0 %v3311_v50  ;;  %v3336_v50 = vld [vmem:[%s4311_s10 + $0x50] sm:$0xff]  }
 0x37d   : > { %1746 = vmatpush2.bf16.msra.mxu0 %v3309_v51  ;;  %v3337_v51 = vld [vmem:[%s4311_s10 + $0x48] sm:$0xff]  }
 0x37e   : > { %1747 = vmatprep.subr.bf16.mxu0 %v3314_v52  ;;  %v3339_v52 = vld [vmem:[%s4311_s10 + $0xf8] sm:$0xff]  }
 0x381   : > { %1748 = vmatpush2.bf16.msra.mxu0 %v3312_v53  ;;  %v3338_v53 = vld [vmem:[%s4311_s10 + $0x40] sm:$0xff]  }
 0x382   : > { %1749 = vmatprep.subr.bf16.mxu0 %v3317_v54  ;;  %v3341_v54 = vld [vmem:[%s4311_s10 + $0xf0] sm:$0xff]  }
 0x385   : > { %1750 = vmatpush2.bf16.msra.mxu0 %v3315_v55  ;;  %v3343_v55 = vld [vmem:[%s4311_s10 + $0xe8] sm:$0xff]  }
 0x386   : > { %1751 = vmatprep.subr.bf16.mxu0 %v3320_v56  ;;  %v3345_v56 = vld [vmem:[%s4311_s10 + $0xe0] sm:$0xff]  }
 0x389   : > { %1752 = vmatpush2.bf16.msra.mxu0 %v3318_v57  ;;  %v3347_v57 = vld [vmem:[%s4311_s10 + $0xd8] sm:$0xff]  }
 0x38a   : > { %1753 = vmatprep.subr.bf16.mxu0 %v3323_v58  ;;  %v3349_v58 = vld [vmem:[%s4311_s10 + $0xd0] sm:$0xff]  }
 0x38d   : > { %1754 = vmatpush2.bf16.msra.mxu0 %v3321_v59  ;;  %v3351_v59 = vld [vmem:[%s4311_s10 + $0xc8] sm:$0xff]  }
 0x38e   : > { %1755 = vmatprep.subr.bf16.mxu0 %v3326_v60  ;;  %v3353_v60 = vld [vmem:[%s4311_s10 + $0xc0] sm:$0xff]  }
 0x391   : > { %1756 = vmatpush2.bf16.msra.mxu0 %v3324_v61  ;;  %v3355_v61 = vld [vmem:[%s4311_s10 + $0x118] sm:$0xff]  }
 0x414   : > { %v1222_v1 = vpop.f32.mrf.mxu0  ;;  %v1496_v2 = vpop.f32.mrf.mxu1 }
 0x415   : > { %v1240_v3 = vadd.f32 %v1233_v63, %v1222_v1  ;;  %v3359_v63 = vld [vmem:[%s4311_s10 + $0x108] sm:$0xff]  }
 0x416   : > { %v1224_v4 = vpop.f32.mrf.mxu0  ;;  %v1498_v5 = vpop.f32.mrf.mxu1 }
 0x417   : > { %v1241_v6 = vadd.f32 %v1237_v0, %v1224_v4  ;;  %v1503_v7 = vadd.f32 %v1496_v2, %v1240_v3  ;;  %v3361_v0 = vld [vmem:[%s4311_s10 + $0x100] sm:$0xff]  }
 0x418   : > { %v1226_v8 = vpop.f32.mrf.mxu0  ;;  %v1500_v9 = vpop.f32.mrf.mxu1 }
 0x419   : > { %v1504_v10 = vadd.f32 %v1498_v5, %v1241_v6  ;;  %v3340_v6 = vld [vmem:[%s4311_s10 + $0x98] sm:$0xff]  }
 0x41a   : > { %v1227_v12 = vpop.f32.mrf.mxu0  ;;  %v1501_v13 = vpop.f32.mrf.mxu1 }
 0x41c   : > { %v1544_v14 = vpop.f32.mrf.mxu0 }
 0x41d   : > { %v1551_v17 = vpack.c.bf16 %v1544_v14, %v1544_v14  ;;  %v3342_v14 = vld [vmem:[%s4311_s10 + $0x90] sm:$0xff]  }
 0x41e   : > { %v1546_v15 = vpop.f32.mrf.mxu0 }
 0x41f   : > { %v1552_v16 = vpack.c.bf16 %v1546_v15, %v1546_v15 }
 0x420   : > { %v1548_v18 = vpop.f32.mrf.mxu0 }
 0x421   : > { %2955 = vmatprep.mubr.msk.bf16.mxu0 %vm1184_vm6, %v1552_v16  ;;  %v3344_v18 = vld [vmem:[%s4311_s10 + $0x88] sm:$0xff]  }
 0x422   : > { %v1549_v19 = vpop.f32.mrf.mxu0  ;;  %1758 = vmatmul.mubr.bf16.vlgmr.msra.gmra.mxu0 %v1551_v17 }
 0x423   : > { %2011 = vmatprep.mubr.bf16.mxu0 %v3467_v25 }
 0x4e2   : > { %v1759_v20 = vpop.f32.mrf.mxu0 }
 0x4e3   : > { %v1766_v22 = vadd.f32 %v1759_v20, %v1503_v7 }
 0x4e4   : > { %v1761_v23 = vpop.f32.mrf.mxu0 }
 0x4e5   : > { %v1768_v24 = vmul.f32 0.3, %v1766_v22  ;;  %v1767_v26 = vadd.f32 %v1761_v23, %v1504_v10  ;;  %v3346_v23 = vld [vmem:[%s4311_s10 + $0x80] sm:$0xff]  }
 0x4e6   : > { %v1763_v27 = vpop.f32.mrf.mxu0 }
 0x4e7   : > { %v1770_v28 = vmax.f32 %v1766_v22, %v1768_v24  ;;  %v1769_v29 = vmul.f32 0.3, %v1767_v26  ;;  %v3348_v24 = vld [vmem:[%s4311_s10 + $0x78] sm:$0xff]   ;;  %v3352_v27 = vld [vmem:[%s4311_s10 + $0x68] sm:$0xff]  }
 0x4e8   : > { %v1764_v31 = vpop.f32.mrf.mxu0 }
 0x4e9   : > { %v1771_v32 = vmax.f32 %v1767_v26, %v1769_v29  ;;  %v1772_v33 = vpack.c.bf16 %v1770_v28, %v1770_v28  ;;  %v3350_v26 = vld [vmem:[%s4311_s10 + $0x70] sm:$0xff]   ;;  %v3354_v28 = vld [vmem:[%s4311_s10 + $0x60] sm:$0xff]   ;;  %v3356_v29 = vld [vmem:[%s4311_s10 + $0xb8] sm:$0xff]  }
 0x4ea   : > { %v3360_v31 = vld [vmem:[%s4311_s10 + $0xa8] sm:$0xff]  }
 0x4eb   : > { %v1773_v35 = vpack.c.bf16 %v1771_v32, %v1771_v32  ;;  %v1785_v36 = vand.u32 %v1783_v34, %v1772_v33  ;;  %v3362_v32 = vld [vmem:[%s4311_s10 + $0xa0] sm:$0xff]  }
 0x4ed   : > { %v1788_v21 = vand.u32 %v1783_v34, %v1773_v35  ;;  %v3363_v34 = vld [vmem:[%s4313_s12 + $0x70] ss:$8 sps:$4 sm:$0xff]   ;;  %v3365_v35 = vld [vmem:[%s4313_s12 + $0x74] ss:$8 sps:$4 sm:$0xff]  }
 0x4ef   : > { %1804 = vmatprep.subr.bf16.mxu1 %v1788_v21  ;;  %1993 = vmatprep.subr.bf16.mxu0 %v1788_v21 }
 0x4f0   : > { %1805 = vmatpush1.bf16.msra.mxu1 %v1785_v36  ;;  %1994 = vmatpush1.bf16.msra.mxu0 %v1785_v36 }
 0x4f1   : > { %2182 = vmatprep.subr.bf16.mxu0 %v1788_v21  ;;  %1933 = vmatprep.subr.bf16.mxu1 %v3467_v25  ;;  %v3368_v21 = vld [vmem:[%s4313_s12 + $0x64] ss:$8 sps:$4 sm:$0xff]  }
 0x4f3   : > { %2956 = vmatmul.mubr.msk.bf16.vlgmr.msra.gmra.mxu1 %vm1776_vm9, %v1775_v37  ;;  %2971 = vmatmul.mubr.msk.bf16.vlgmr.msra.gmra.mxu0 %vm1776_vm9, %v2970_v11  ;;  %v3369_v37 = vld [vmem:[%s4313_s12 + $0x50] ss:$8 sps:$4 sm:$0xff]   ;;  %v3374_v11 = vld [vmem:[%s4313_s12 + $0x44] ss:$8 sps:$4 sm:$0xff]  }
 0x4f4   : > { %2183 = vmatpush1.bf16.msra.mxu0 %v1785_v36  ;;  %2200 = vmatprep.mubr.bf16.mxu0 %v3467_v25  ;;  %v3366_v36 = vld [vmem:[%s4313_s12 + $0x60] ss:$8 sps:$4 sm:$0xff]  }
 0x4f5   : > { %1934 = vmatpush1.bf16.msra.mxu1 %v3327_v38  ;;  %2311 = vmatprep.subr.bf16.mxu0 %v3467_v25  ;;  %v3372_v38 = vld [vmem:[%s4313_s12 + $0x40] ss:$8 sps:$4 sm:$0xff]  }
 0x4f6   : > { %1935 = vmatprep.subr.bf16.mxu1 %v3467_v25 }
 0x4f9   : > { %1936 = vmatpush1.bf16.msra.mxu1 %v3328_v39  ;;  %v3377_v39 = vld [vmem:[%s4313_s12 + $0x34] ss:$8 sps:$4 sm:$0xff]  }
 0x4fa   : > { %1937 = vmatprep.subr.bf16.mxu1 %v3467_v25 }
 0x4fb   : > { %3010 = vmatmul.mubr.msk.bf16.vlgmr.msra.gmra.mxu0 %vm1776_vm9, %v3009_v40  ;;  %v3375_v40 = vld [vmem:[%s4313_s12 + $0x30] ss:$8 sps:$4 sm:$0xff]  }
 0x4fc   : > { %2312 = vmatpush1.bf16.msra.mxu0 %v3339_v52  ;;  %v3390_v52 = vld [vmem:[%s4315_s14 + $0x30] sm:$0xff]  }
 0x4fd   : > { %1938 = vmatpush1.bf16.msra.mxu1 %v3329_v41  ;;  %2313 = vmatprep.subr.bf16.mxu0 %v3467_v25  ;;  %v3380_v41 = vld [vmem:[%s4313_s12 + $0x24] ss:$8 sps:$4 sm:$0xff]  }
 0x4fe   : > { %1939 = vmatprep.subr.bf16.mxu1 %v3467_v25 }
 0x500   : > { %2314 = vmatpush1.bf16.msra.mxu0 %v3341_v54  ;;  %v3392_v54 = vld [vmem:[%s4315_s14 + $0x28] sm:$0xff]  }
 0x501   : > { %1940 = vmatpush1.bf16.msra.mxu1 %v3330_v42  ;;  %2315 = vmatprep.subr.bf16.mxu0 %v3467_v25  ;;  %v3378_v42 = vld [vmem:[%s4313_s12 + $0x20] ss:$8 sps:$4 sm:$0xff]  }
 0x502   : > { %1941 = vmatprep.subr.bf16.mxu1 %v3467_v25 }
 0x504   : > { %2316 = vmatpush1.bf16.msra.mxu0 %v3343_v55  ;;  %v3393_v55 = vld [vmem:[%s4315_s14 + $0x60] sm:$0xff]  }
 0x505   : > { %1942 = vmatpush1.bf16.msra.mxu1 %v3331_v43  ;;  %2317 = vmatprep.subr.bf16.mxu0 %v3467_v25  ;;  %v3383_v43 = vld [vmem:[%s4313_s12 + $0x14] ss:$8 sps:$4 sm:$0xff]  }
 0x506   : > { %1943 = vmatprep.subr.bf16.mxu1 %v3467_v25 }
 0x508   : > { %2318 = vmatpush1.bf16.msra.mxu0 %v3345_v56  ;;  %v3394_v56 = vld [vmem:[%s4315_s14 + $0x20] sm:$0xff]  }
 0x509   : > { %1944 = vmatpush1.bf16.msra.mxu1 %v3332_v44  ;;  %2319 = vmatprep.subr.bf16.mxu0 %v3467_v25  ;;  %v3381_v44 = vld [vmem:[%s4313_s12 + $0x10] ss:$8 sps:$4 sm:$0xff]  }
 0x50a   : > { %1945 = vmatprep.subr.bf16.mxu1 %v3467_v25 }
 0x50c   : > { %2320 = vmatpush1.bf16.msra.mxu0 %v3347_v57  ;;  %v3395_v57 = vld [vmem:[%s4315_s14 + $0x58] sm:$0xff]  }
 0x50d   : > { %1946 = vmatpush1.bf16.msra.mxu1 %v3333_v46  ;;  %2321 = vmatprep.subr.bf16.mxu0 %v3467_v25  ;;  %v3386_v46 = vld [vmem:[%s4313_s12 + $0x4] ss:$8 sps:$4 sm:$0xff]  }
 0x50e   : > { %1947 = vmatprep.subr.bf16.mxu1 %v3467_v25 }
 0x510   : > { %2322 = vmatpush1.bf16.msra.mxu0 %v3349_v58  ;;  %v3396_v58 = vld [vmem:[%s4315_s14 + $0x18] sm:$0xff]  }
 0x511   : > { %1948 = vmatpush1.bf16.msra.mxu1 %v3334_v48  ;;  %2323 = vmatprep.subr.bf16.mxu0 %v3467_v25  ;;  %v3384_v48 = vld [vmem:[%s4313_s12] ss:$8 sps:$4 sm:$0xff]  }
 0x512   : > { %1957 = vmatprep.subr.bf16.mxu1 %v3467_v25 }
 0x514   : > { %2324 = vmatpush1.bf16.msra.mxu0 %v3351_v59 }
 0x515   : > { %1958 = vmatpush2.bf16.msra.mxu1 %v3335_v49  ;;  %2325 = vmatprep.subr.bf16.mxu0 %v3467_v25  ;;  %v3387_v49 = vld [vmem:[%s4315_s14 + $0x78] sm:$0xff]  }
 0x516   : > { %1959 = vmatprep.subr.bf16.mxu1 %v3467_v25 }
 0x518   : > { %2326 = vmatpush1.bf16.msra.mxu0 %v3353_v60 }
 0x519   : > { %1960 = vmatpush2.bf16.msra.mxu1 %v3336_v50  ;;  %2335 = vmatprep.subr.bf16.mxu0 %v3467_v25  ;;  %v3388_v50 = vld [vmem:[%s4315_s14 + $0x38] sm:$0xff]  }
 0x51a   : > { %1961 = vmatprep.subr.bf16.mxu1 %v3467_v25 }
 0x51c   : > { %2336 = vmatpush2.bf16.msra.mxu0 %v3355_v61 }
 0x51d   : > { %1962 = vmatpush2.bf16.msra.mxu1 %v3337_v51  ;;  %2337 = vmatprep.subr.bf16.mxu0 %v3467_v25  ;;  %v3389_v51 = vld [vmem:[%s4315_s14 + $0x70] sm:$0xff]  }
 0x51e   : > { %1963 = vmatprep.subr.bf16.mxu1 %v3467_v25 }
 0x520   : > { %2338 = vmatpush2.bf16.msra.mxu0 %v3357_v62 }
 0x521   : > { %1964 = vmatpush2.bf16.msra.mxu1 %v3338_v53  ;;  %2339 = vmatprep.subr.bf16.mxu0 %v3467_v25  ;;  %v3391_v53 = vld [vmem:[%s4315_s14 + $0x68] sm:$0xff]  }
 0x522   : > { %2122 = vmatprep.subr.bf16.mxu1 %v3467_v25 }
 0x524   : > { %2340 = vmatpush2.bf16.msra.mxu0 %v3359_v63 }
 0x525   : > { %2341 = vmatprep.subr.bf16.mxu0 %v3467_v25 }
 0x528   : > { %2342 = vmatpush2.bf16.msra.mxu0 %v3361_v0 }
 0x529   : > { %3091 = vmatprep.subr.bf16.mxu0 %v3387_v49 }
 0x5b3   : > { %v1824_v1 = vpop.f32.mrf.mxu1  ;;  %v2013_v2 = vpop.f32.mrf.mxu0 }
 0x5b4   : > { %v1831_v8 = vpack.c.bf16 %v1824_v1, %v1824_v1  ;;  %v2020_v33 = vpack.c.bf16 %v2013_v2, %v2013_v2 }
 0x5b5   : > { %v1826_v3 = vpop.f32.mrf.mxu1  ;;  %v2015_v4 = vpop.f32.mrf.mxu0 }
 0x5b6   : > { %v1832_v5 = vpack.c.bf16 %v1826_v3, %v1826_v3  ;;  %v2021_v7 = vpack.c.bf16 %v2015_v4, %v2015_v4  ;;  %v1774_v3 = vld [vmem:[%s4312_s11] sm:$0x1] }
 0x5b7   : > { %v1828_v9 = vpop.f32.mrf.mxu1  ;;  %v2017_v10 = vpop.f32.mrf.mxu0 }
 0x5b8   : > { %2969 = vmatprep.mubr.msk.bf16.mxu1 %vm1929_vm10, %v1832_v5 }
 0x5b9   : > { %v1829_v12 = vpop.f32.mrf.mxu1  ;;  %1966 = vmatmul.mubr.bf16.vlgmr.msra.gmra.mxu1 %v1831_v8  ;;  %v2018_v13 = vpop.f32.mrf.mxu0 }
 0x5ba   : > { %2123 = vmatpush1.bf16.msra.mxu1 %v3340_v6  ;;  %3008 = vmatprep.mubr.msk.bf16.mxu1 %vm1929_vm10, %v2021_v7 }
 0x5bb   : > { %2124 = vmatprep.subr.bf16.mxu1 %v3467_v25  ;;  %v2202_v15 = vpop.f32.mrf.mxu0 }
 0x5bc   : > { %v2209_v16 = vpack.c.bf16 %v2202_v15, %v2202_v15  ;;  %v3397_v15 = vld [vmem:[%s4315_s14 + $0x50] sm:$0xff]  }
 0x5bd   : > { %v2204_v17 = vpop.f32.mrf.mxu0 }
 0x5be   : > { %2125 = vmatpush1.bf16.msra.mxu1 %v3342_v14  ;;  %v2210_v19 = vpack.c.bf16 %v2204_v17, %v2204_v17  ;;  %v3399_v17 = vld [vmem:[%s4315_s14 + $0x48] sm:$0xff]  }
 0x5bf   : > { %2126 = vmatprep.subr.bf16.mxu1 %v3467_v25  ;;  %v2206_v20 = vpop.f32.mrf.mxu0 }
 0x5c0   : > { %3047 = vmatprep.mubr.msk.bf16.mxu0 %vm1929_vm10, %v2210_v19  ;;  %v3401_v19 = vld [vmem:[%s4315_s14 + $0x40] sm:$0xff]  }
 0x5c1   : > { %2344 = vmatmul.mubr.bf16.vlgmr.msra.gmra.mxu0 %v2209_v16  ;;  %v2207_v22 = vpop.f32.mrf.mxu0  ;;  %v3398_v16 = vld [vmem:[%s4315_s14 + $0x10] sm:$0xff]   ;;  %v3402_v20 = vld [vmem:[%s4315_s14] sm:$0xff]  }
 0x5c2   : > { %2127 = vmatpush1.bf16.msra.mxu1 %v3344_v18  ;;  %3092 = vmatpush3.bf16.msra.mxu0 %v3388_v50  ;;  %v3400_v18 = vld [vmem:[%s4315_s14 + $0x8] sm:$0xff]   ;;  %v2372_v22 = vld [vmem:[%s4314_s13] sm:$0x3] }
 0x5c3   : > { %2128 = vmatprep.subr.bf16.mxu1 %v3467_v25  ;;  %3093 = vmatprep.subr.bf16.mxu0 %v3389_v51 }
 0x5c6   : > { %2129 = vmatpush1.bf16.msra.mxu1 %v3346_v23  ;;  %3094 = vmatpush3.bf16.msra.mxu0 %v3390_v52  ;;  %v2457_v23 = vrot.slane %v2372_v22, %v3695_v45 }
 0x5c7   : > { %2130 = vmatprep.subr.bf16.mxu1 %v3467_v25  ;;  %3095 = vmatprep.subr.bf16.mxu0 %v3391_v53 }
 0x5ca   : > { %2131 = vmatpush1.bf16.msra.mxu1 %v3348_v24  ;;  %3096 = vmatpush3.bf16.msra.mxu0 %v3392_v54  ;;  %v2461_v24 = vrot.slane %v2372_v22, %v3700_v47  ;;  %v2543_v47 = vld [vmem:[%s4316_s15] sm:$0x1] }
 0x5cb   : > { %2132 = vmatprep.subr.bf16.mxu1 %v3467_v25  ;;  %3097 = vmatprep.subr.bf16.mxu0 %v3393_v55 }
 0x5ce   : > { %2133 = vmatpush1.bf16.msra.mxu1 %v3350_v26  ;;  %3098 = vmatpush3.bf16.msra.mxu0 %v3394_v56 }
 0x5cf   : > { %2134 = vmatprep.subr.bf16.mxu1 %v3467_v25  ;;  %3099 = vmatprep.subr.bf16.mxu0 %v3395_v57 }
 0x5d2   : > { %2135 = vmatpush1.bf16.msra.mxu1 %v3352_v27  ;;  %3100 = vmatpush3.bf16.msra.mxu0 %v3396_v58 }
 0x5d3   : > { %2136 = vmatprep.subr.bf16.mxu1 %v3467_v25  ;;  %3101 = vmatprep.subr.bf16.mxu0 %v3397_v15 }
 0x5d6   : > { %2137 = vmatpush1.bf16.msra.mxu1 %v3354_v28  ;;  %3102 = vmatpush3.bf16.msra.mxu0 %v3398_v16 }
 0x5d7   : > { %2146 = vmatprep.subr.bf16.mxu1 %v3467_v25  ;;  %3103 = vmatprep.subr.bf16.mxu0 %v3399_v17 }
 0x5da   : > { %2147 = vmatpush2.bf16.msra.mxu1 %v3356_v29  ;;  %3104 = vmatpush3.bf16.msra.mxu0 %v3400_v18 }
 0x5db   : > { %2148 = vmatprep.subr.bf16.mxu1 %v3467_v25  ;;  %3105 = vmatprep.subr.bf16.mxu0 %v3401_v19 }
 0x5de   : > { %2149 = vmatpush2.bf16.msra.mxu1 %v3358_v30  ;;  %3106 = vmatpush3.bf16.msra.mxu0 %v3402_v20 }
 0x5df   : > { %2150 = vmatprep.subr.bf16.mxu1 %v3467_v25 }
 0x5e2   : > { %2151 = vmatpush2.bf16.msra.mxu1 %v3360_v31 }
 0x5e3   : > { %2152 = vmatprep.subr.bf16.mxu1 %v3467_v25 }
 0x5e6   : > { %2153 = vmatpush2.bf16.msra.mxu1 %v3362_v32 }
 0x5e7   : > { %2464 = vmatprep.subr.bf16.mxu1 %v3365_v35 }
 0x5e9   : > { %2155 = vmatmul.mubr.bf16.vlgmr.msra.gmra.mxu1 %v2020_v33 }
 0x5ea   : > { %2496 = vmatprep.mubr.bf16.mxu1 %v3467_v25  ;;  %2465 = vmatpush1.bf16.msra.mxu1 %v3363_v34  ;;  %v3371_v25 = vld [vmem:[%s4313_s12 + $0x54] ss:$8 sps:$4 sm:$0xff]  }
 0x5eb   : > { %2466 = vmatprep.subr.bf16.mxu1 %v3368_v21 }
 0x5ee   : > { %2467 = vmatpush1.bf16.msra.mxu1 %v3366_v36 }
 0x5ef   : > { %2468 = vmatprep.subr.bf16.mxu1 %v3371_v25 }
 0x5f2   : > { %2469 = vmatpush1.bf16.msra.mxu1 %v3369_v37 }
 0x5f3   : > { %2470 = vmatprep.subr.bf16.mxu1 %v3374_v11 }
 0x5f6   : > { %2471 = vmatpush1.bf16.msra.mxu1 %v3372_v38 }
 0x5f7   : > { %2472 = vmatprep.subr.bf16.mxu1 %v3377_v39 }
 0x5fa   : > { %2473 = vmatpush1.bf16.msra.mxu1 %v3375_v40 }
 0x5fb   : > { %2474 = vmatprep.subr.bf16.mxu1 %v3380_v41 }
 0x5fe   : > { %2475 = vmatpush1.bf16.msra.mxu1 %v3378_v42 }
 0x5ff   : > { %2476 = vmatprep.subr.bf16.mxu1 %v3383_v43 }
 0x602   : > { %2477 = vmatpush1.bf16.msra.mxu1 %v3381_v44 }
 0x603   : > { %2478 = vmatprep.subr.bf16.mxu1 %v3386_v46 }
 0x606   : > { %2479 = vmatpush1.bf16.msra.mxu1 %v3384_v48 }
 0x679   : > { %v1967_v59 = vpop.f32.mrf.mxu1 }
 0x67a   : > { %v1973_v4 = vadd.f32 %v1967_v59, %v1774_v3 }
 0x67b   : > { %v1969_v60 = vpop.f32.mrf.mxu1 }
 0x67d   : > { %v1970_v61 = vpop.f32.mrf.mxu1 }
 0x67f   : > { %v1971_v62 = vpop.f32.mrf.mxu1 }
 0x681   : > { %v2345_v63 = vpop.f32.mrf.mxu0 }
 0x683   : > { %v2347_v0 = vpop.f32.mrf.mxu0 }
 0x685   : > { %v2348_v1 = vpop.f32.mrf.mxu0 }
 0x687   : > { %v2349_v2 = vpop.f32.mrf.mxu0 }
 0x6a9   : > { %v2156_v5 = vpop.f32.mrf.mxu1 }
 0x6aa   : > { %v2162_v6 = vadd.f32 %v2156_v5, %v1973_v4 }
 0x6ab   : > { %v2158_v7 = vpop.f32.mrf.mxu1 }
 0x6ac   : > { %v2351_v8 = vadd.f32 %v2345_v63, %v2162_v6 }
 0x6ad   : > { %v2159_v9 = vpop.f32.mrf.mxu1 }
 0x6ae   : > { %v2352_v10 = vmul.f32 0.3, %v2351_v8 }
 0x6af   : > { %v2160_v12 = vpop.f32.mrf.mxu1 }
 0x6b0   : > { %v2353_v13 = vmax.f32 %v2351_v8, %v2352_v10 }
 0x6b2   : > { %v2355_v14 = vpack.c.bf16 %v2353_v13, %v2353_v13 }
 0x6b4   : > { %2497 = vmatmul.mubr.bf16.vlgmr.msra.gmra.mxu1 %v2355_v14 }
 0x774   : > { %v2498_v26 = vpop.f32.mrf.mxu1 }
 0x775   : > { %v2499_v27 = vadd.f32 %v2498_v26, %v2457_v23 }
 0x776   : > { %v2500_v28 = vpop.f32.mrf.mxu1 }
 0x777   : > { %v2505_v29 = vmul.f32 0.3, %v2499_v27  ;;  %v2501_v30 = vadd.f32 %v2500_v28, %v2461_v24 }
 0x778   : > { %v2502_v31 = vpop.f32.mrf.mxu1 }
 0x779   : > { %v2506_v32 = vmul.f32 0.3, %v2501_v30  ;;  %v2507_v33 = vmax.f32 %v2499_v27, %v2505_v29 }
 0x77a   : > { %v2503_v34 = vpop.f32.mrf.mxu1 }
 0x77b   : > { %v2508_v35 = vmax.f32 %v2501_v30, %v2506_v32  ;;  %v2509_v36 = vpack.c.bf16 %v2507_v33, %v2507_v33 }
 0x77d   : > { %v2510_v21 = vpack.c.bf16 %v2508_v35, %v2508_v35 }
 0x77f   : > { %2672 = vmatprep.mubr.bf16.mxu0 %v2510_v21 }
 0x780   : > { %2673 = vmatmul.mubr.bf16.vlgmr.msra.gmra.mxu0 %v2509_v36 }
 0x840   : > { %v3107_v45 = vpop.f32.mrf.mxu0 }
 0x842   : > { %v3108_v25 = vpop.f32.mrf.mxu0 }
 0x843   : > { %v3109_v37 = vadd.f32 %v3108_v25, %v3107_v45 }
 0x844   : > { %v3110_v11 = vpop.f32.mrf.mxu0 }
 0x845   : > { %v2675_v38 = vadd.f32 %v3109_v37, %v2543_v47 }
 0x846   : > { %v3111_v39 = vpop.f32.mrf.mxu0 }
 0x847   : > { %2681 = vst.msk [vmem:[%s529_s24] sm:$0x1] %vm2680_vm11, %v2675_v38 }
 0x848   : > { %3416 = shalt.err (!%p3413_p3)
}
 0x849   : > { %s3417_s30 = scalar_lea.hbm %s4266_s17, 16  ;;  %s3421_s24 = scalar_lea.hbm %s4317_s16, 32 }
 0x84a   : > { %p3418_p4 = scmp.ne.s32.totalorder %s4266_s17, %s3417_s30  ;;  %p3422_p9 = scmp.lt.s32.totalorder %s4266_s17, %s4317_s16 }
 0x84b   : > { %p3423_p10 = scmp.lt.s32.totalorder %s3421_s24, %s3417_s30 }
 0x84c   : > { %p3419_p7 = pnand %p3418_p4, %p3596_p5 }
 0x84d   : > { %p3424_p11 = por %p3423_p10, %p3422_p9 }
 0x84e   : > { %p3420_p8 = pneg %p3419_p7 }
 0x850   : > { %p3425_p12 = pnand %p3424_p11, %p3420_p8 }
 0x852   : > { %3428 = shalt.err (!%p3425_p12)
}
 0x853   : > { %3131 = dma.vmem_to_hbm [thread:$0]  (%p3596_p5), %s2696_s20, 16, %s4266_s17, %s2683_s22  }
 0x854 PF: > { %s4334_s26 = sld [smem:[#allocation8_spill]] }
 0x855   : > { %s4335_s28 = sld [smem:[#allocation6_spill]] }
 0x85a   : > { %p3137_p13 = scmp.ge.s32.totalorder %s4334_s26, 2 }
 0x85b   : > { %s2707_s23 = sand.u32 1, %s4335_s28  }
 0x85c   : > { %p3134_p0 = pnand %p3137_p13, %p3600_p6  ;;  %s2708_s21 = scalar_lea.sflag [#allocation4], %s2707_s23 }
 0x85e   : > { %p3135_p1 = pneg %p3134_p0 }
 0x860   : > { %3446 = dma.done.wait (%p3135_p1), %s2708_s21, 16  }
 0x861   : > { %3448 = vsyncadd (%p3135_p1), %s2708_s21, 4294967280  ;;  %s4337_s27 = sld [smem:[#allocation9_spill]]  ;;  %s4340_s24 = smov %s3455_s25 }
 0x862   : > { %s4338_s30 = sld [smem:[#allocation7_spill]] }
 0x863   : > { %s4339_s26 = sld [smem:[#allocation10_spill]] }
 0x867   : > { %p27_p2 = scmp.ge.s32.totalorder %s4337_s27, 4  }
 0x868   : > { %s4341_s25 = smov %s4338_s30 }
 0x869   :  { %29 = sbr.rel (!%p27_p2) target bundleno = 12 (0xc), region = 134 }
 0x86e   :  { %2712 = vsyncpa [#allocation4], 1 }
 0x86f   :  { %2714 = vsyncpa [#allocation4 + $0x1], 1 }

</bundles_post_ra>
